<compile_context>
chip_gen: v5e
topology: v5e:2x2
jax: 0.10.0
libtpu: 0.0.40
codegen_flags: <defaults>
</compile_context>

<pallas_src>
import functools

import jax
import jax.numpy as jnp
from jax.experimental import pallas as pl
from jax.experimental.pallas import tpu as pltpu


def _round_up(x, m):
    return (x + m - 1) // m * m


def _block_diag(w, g):
    """(in, out) -> (g*in, g*out): g copies of w on the block diagonal."""
    if g == 1:
        return w
    in_f, out_f = w.shape
    eye = jnp.eye(g, dtype=w.dtype)
    return (eye[:, None, :, None] * w[None, :, None, :]).reshape(g * in_f, g * out_f)


def make_nerf_kernel(num_linears):
    """Kernel refs layout: (x, w0, b0, w1, b1, ..., w_{L-1}, b_{L-1}, out)."""

    def kernel(*refs):
        x_ref = refs[0]
        out_ref = refs[-1]

        h = x_ref[...].astype(jnp.float32)
        for i in range(num_linears):
            w = refs[1 + 2 * i][...]                      # bf16 or f32 (wrapper choice)
            b = refs[2 + 2 * i][...].astype(jnp.float32)  # (1, width), broadcasts over rows
            # Cast activations to the weight dtype only at the MXU input;
            # accumulate in f32.  Bias-add / ReLU stay in f32 (v5e friendly).
            h = jnp.dot(h.astype(w.dtype), w, preferred_element_type=jnp.float32) + b
            if i < num_linears - 1:
                h = jnp.maximum(h, 0.0)

        out_ref[...] = h.astype(out_ref.dtype)

    return kernel


def nerf_forward(x, weights, biases, *, tile_n=2048, group=None,
                 compute_dtype=jnp.bfloat16, mxu_width=256):
    """x: (N, input_dims); weights[i]: (in_i, out_i); biases[i]: (1, out_i).

    group: rows folded per packed row (block-diagonal lane packing).  Default:
    auto so that group*hidden ~= mxu_width (256 for v6e/v7x; pass mxu_width=128
    on v5e if hidden is narrow).
    """
    num_linears = len(weights)
    n, in_dims = x.shape
    hidden = weights[0].shape[1]
    out_dims = weights[-1].shape[1]

    # ---- lane-packing factor.
    g = int(group) if group is not None else max(1, mxu_width // hidden)

    # ---- packed parameters: block-diag weights (compute dtype), lane-tiled f32 biases.
    ws, bs = [], []
    for w, b in zip(weights, biases):
        ws.append(_block_diag(w, g).astype(compute_dtype))
        bs.append((jnp.tile(b, (1, g)) if g > 1 else b).astype(jnp.float32))

    in_w, out_w, width = g * in_dims, g * out_dims, g * hidden

    # ---- fold rows into lanes + ragged-tail row padding (pad only the narrow
    # (N, in_dims) input; padded rows produce bias-driven garbage sliced off below).
    # TODO(synk): for very large N, replace the tail pad/slice with masked
    # tail-block writes to make this a strict single pass over x and out.
    rows = pl.cdiv(n, g)
    tile_rows = min(_round_up(tile_n, 8), _round_up(rows, 8))
    rows_pad = _round_up(rows, tile_rows)
    n_pad = rows_pad * g
    x_p = jnp.pad(x, ((0, n_pad - n), (0, 0))) if n_pad != n else x
    x_p = x_p.reshape(rows_pad, in_w)
    grid = (rows_pad // tile_rows,)

    flat_params = []
    for w, b in zip(ws, bs):
        flat_params += [w, b]

    # ---- block specs: activations tiled over rows; params VMEM-resident
    # (constant index_map) across all grid steps.
    in_specs = [pl.BlockSpec((tile_rows, in_w), lambda i: (i, 0))]
    for w, b in zip(ws, bs):
        in_specs.append(pl.BlockSpec(w.shape, lambda i: (0, 0)))
        in_specs.append(pl.BlockSpec(b.shape, lambda i: (0, 0)))
    out_specs = pl.BlockSpec((tile_rows, out_w), lambda i: (i, 0))

    # ---- scheduler hint with true (unpadded) work.
    flops = 2 * n * sum(w.shape[0] * w.shape[1] for w in weights)
    param_bytes = sum(p.size * p.dtype.itemsize for p in flat_params)
    bytes_accessed = (n * in_dims + n * out_dims) * x.dtype.itemsize + param_bytes
    cost = pl.CostEstimate(flops=flops, transcendentals=0,
                           bytes_accessed=bytes_accessed)

    # ---- VMEM budget: double-buffered x/out blocks (lane-padded to 128 in VMEM)
    # + resident params + f32 hidden activations, with headroom; capped at 32 MiB
    # (safe on v5e/v6e/v7x; actual need ~10 MiB at the defaults).
    blk_bytes = tile_rows * (_round_up(in_w, 128) + _round_up(out_w, 128)) * 4
    h_bytes = tile_rows * _round_up(width, 128) * 4
    vmem_limit = int(min(32 * 1024 * 1024,
                         max(16 * 1024 * 1024,
                             2 * blk_bytes + param_bytes + 2 * h_bytes + (2 << 20))))

    out = pl.pallas_call(
        make_nerf_kernel(num_linears),
        out_shape=jax.ShapeDtypeStruct((rows_pad, out_w), x.dtype),
        grid=grid,
        in_specs=in_specs,
        out_specs=out_specs,
        compiler_params=pltpu.CompilerParams(
            # Rows are independent: shard the row axis across both v7x TCs.
            # TODO(synk): if profiling shows one v7x TC idle, switch this axis
            # to pltpu.CORE_PARALLEL.
            dimension_semantics=("parallel",),
            vmem_limit_bytes=vmem_limit,
        ),
        cost_estimate=cost,
    )(x_p, *flat_params)

    # Unpack: row-major reshape (free) + cheap tail-row slice on the 4-wide output.
    out = out.reshape(n_pad, out_dims)
    return out[:n] if n_pad != n else out


def nerf_reference(x, weights, biases, compute_dtype=jnp.float32):
    """Plain-JAX reference; compute_dtype mirrors the kernel's MXU input dtype."""
    h = x.astype(jnp.float32)
    for i, (w, b) in enumerate(zip(weights, biases)):
        h = jnp.dot(h.astype(compute_dtype), w.astype(compute_dtype),
                    preferred_element_type=jnp.float32) + b.astype(jnp.float32)
        if i < len(weights) - 1:
            h = jnp.maximum(h, 0.0)
    return h.astype(x.dtype)


def init_params(key, input_dims, output_dims, hidden_dims, num_layers):
    """Deterministic init mirroring the nn.Linear shapes of the PyTorch module."""
    dims = []
    d_in = input_dims
    for _ in range(num_layers):
        dims.append((d_in, hidden_dims))
        d_in = hidden_dims
    dims.append((hidden_dims, output_dims))

    weights, biases = [], []
    for (fan_in, fan_out) in dims:
        key, kw, kb = jax.random.split(key, 3)
        bound = 1.0 / jnp.sqrt(fan_in)
        # stored as (in, out) == transposed PyTorch weight
        weights.append(jax.random.uniform(kw, (fan_in, fan_out), jnp.float32, -bound, bound))
        biases.append(jax.random.uniform(kb, (1, fan_out), jnp.float32, -bound, bound))
    return weights, biases


if __name__ == "__main__":
    INPUT_DIMS, OUTPUT_DIMS, NUM_LAYERS = 3, 4, 8
    key = jax.random.PRNGKey(0)

    # --- Case 1: module defaults (hidden_dims=256, x = randn(10, 3)).
    # Width 256 is already MXU-native (G=1); bf16 MXU inputs + f32 accumulation.
    key, kp1, kx1 = jax.random.split(key, 3)
    w1, b1 = init_params(kp1, INPUT_DIMS, OUTPUT_DIMS, hidden_dims=256,
                         num_layers=NUM_LAYERS)
    x1 = jax.random.normal(kx1, (10, INPUT_DIMS), dtype=jnp.float32)
    fwd1 = jax.jit(functools.partial(nerf_forward, weights=w1, biases=b1,
                                     compute_dtype=jnp.bfloat16))
    out1 = jax.block_until_ready(fwd1(x1))
    assert out1.shape == (10, OUTPUT_DIMS)
    ref1_mixed = nerf_reference(x1, w1, b1, compute_dtype=jnp.bfloat16)
    ref1_f32 = nerf_reference(x1, w1, b1)
    assert jnp.allclose(out1, ref1_mixed, atol=1e-2, rtol=1e-2)   # kernel mechanics
    assert jnp.allclose(out1, ref1_f32, atol=1e-1, rtol=1e-1)     # bf16 fidelity

    # --- Case 2: narrow hidden (32) exercises block-diagonal lane packing
    # (G=8 -> packed width 256), a multi-step row grid and the ragged tail,
    # on the pure-f32 compute path for a tight check.
    key, kp2, kx2 = jax.random.split(key, 3)
    w2, b2 = init_params(kp2, INPUT_DIMS, OUTPUT_DIMS, hidden_dims=32,
                         num_layers=NUM_LAYERS)
    x2 = jax.random.normal(kx2, (300, INPUT_DIMS), dtype=jnp.float32)
    out2 = jax.block_until_ready(
        nerf_forward(x2, w2, b2, tile_n=16, compute_dtype=jnp.float32))
    assert out2.shape == (300, OUTPUT_DIMS)
    ref2 = nerf_reference(x2, w2, b2)
    assert jnp.allclose(out2, ref2, atol=1e-3, rtol=1e-3)

    print("KERNEL_OK")
</pallas_src>

<mosaic_0001>
module attributes {stable_mosaic.version = 11 : i64} {
  func.func @kernel(%arg0: i32, %arg1: memref<16x3xf32, #tpu.memory_space<vmem>>, %arg2: memref<3x256xbf16, #tpu.memory_space<vmem>>, %arg3: memref<1x256xf32, #tpu.memory_space<vmem>>, %arg4: memref<256x256xbf16, #tpu.memory_space<vmem>>, %arg5: memref<1x256xf32, #tpu.memory_space<vmem>>, %arg6: memref<256x256xbf16, #tpu.memory_space<vmem>>, %arg7: memref<1x256xf32, #tpu.memory_space<vmem>>, %arg8: memref<256x256xbf16, #tpu.memory_space<vmem>>, %arg9: memref<1x256xf32, #tpu.memory_space<vmem>>, %arg10: memref<256x256xbf16, #tpu.memory_space<vmem>>, %arg11: memref<1x256xf32, #tpu.memory_space<vmem>>, %arg12: memref<256x256xbf16, #tpu.memory_space<vmem>>, %arg13: memref<1x256xf32, #tpu.memory_space<vmem>>, %arg14: memref<256x256xbf16, #tpu.memory_space<vmem>>, %arg15: memref<1x256xf32, #tpu.memory_space<vmem>>, %arg16: memref<256x256xbf16, #tpu.memory_space<vmem>>, %arg17: memref<1x256xf32, #tpu.memory_space<vmem>>, %arg18: memref<256x4xbf16, #tpu.memory_space<vmem>>, %arg19: memref<1x4xf32, #tpu.memory_space<vmem>>, %arg20: memref<16x4xf32, #tpu.memory_space<vmem>>) attributes {dimension_semantics = [#tpu.dimension_semantics<parallel>], iteration_bounds = array<i64: 1>, scalar_prefetch = 0 : i64, scratch_operands = 0 : i64, tpu.core_type = #tpu.core_type<tc>, window_params = [{transform_indices = @transform_0, window_bounds = array<i64: 16, 3>}, {pipeline_mode = #tpu.pipeline_mode<synchronous>, transform_indices = @transform_1, window_bounds = array<i64: 3, 256>}, {pipeline_mode = #tpu.pipeline_mode<synchronous>, transform_indices = @transform_2, window_bounds = array<i64: 1, 256>}, {pipeline_mode = #tpu.pipeline_mode<synchronous>, transform_indices = @transform_3, window_bounds = array<i64: 256, 256>}, {pipeline_mode = #tpu.pipeline_mode<synchronous>, transform_indices = @transform_4, window_bounds = array<i64: 1, 256>}, {pipeline_mode = #tpu.pipeline_mode<synchronous>, transform_indices = @transform_5, window_bounds = array<i64: 256, 256>}, {pipeline_mode = #tpu.pipeline_mode<synchronous>, transform_indices = @transform_6, window_bounds = array<i64: 1, 256>}, {pipeline_mode = #tpu.pipeline_mode<synchronous>, transform_indices = @transform_7, window_bounds = array<i64: 256, 256>}, {pipeline_mode = #tpu.pipeline_mode<synchronous>, transform_indices = @transform_8, window_bounds = array<i64: 1, 256>}, {pipeline_mode = #tpu.pipeline_mode<synchronous>, transform_indices = @transform_9, window_bounds = array<i64: 256, 256>}, {pipeline_mode = #tpu.pipeline_mode<synchronous>, transform_indices = @transform_10, window_bounds = array<i64: 1, 256>}, {pipeline_mode = #tpu.pipeline_mode<synchronous>, transform_indices = @transform_11, window_bounds = array<i64: 256, 256>}, {pipeline_mode = #tpu.pipeline_mode<synchronous>, transform_indices = @transform_12, window_bounds = array<i64: 1, 256>}, {pipeline_mode = #tpu.pipeline_mode<synchronous>, transform_indices = @transform_13, window_bounds = array<i64: 256, 256>}, {pipeline_mode = #tpu.pipeline_mode<synchronous>, transform_indices = @transform_14, window_bounds = array<i64: 1, 256>}, {pipeline_mode = #tpu.pipeline_mode<synchronous>, transform_indices = @transform_15, window_bounds = array<i64: 256, 256>}, {pipeline_mode = #tpu.pipeline_mode<synchronous>, transform_indices = @transform_16, window_bounds = array<i64: 1, 256>}, {pipeline_mode = #tpu.pipeline_mode<synchronous>, transform_indices = @transform_17, window_bounds = array<i64: 256, 4>}, {pipeline_mode = #tpu.pipeline_mode<synchronous>, transform_indices = @transform_18, window_bounds = array<i64: 1, 4>}, {transform_indices = @transform_19, window_bounds = array<i64: 16, 4>}]} {
    %c0 = arith.constant 0 : index
    %c0_0 = arith.constant 0 : index
    %0 = vector.load %arg1[%c0, %c0_0] : memref<16x3xf32, #tpu.memory_space<vmem>>, vector<16x3xf32>
    %c0_1 = arith.constant 0 : index
    %c0_2 = arith.constant 0 : index
    %1 = vector.load %arg2[%c0_1, %c0_2] : memref<3x256xbf16, #tpu.memory_space<vmem>>, vector<3x256xbf16>
    %c0_3 = arith.constant 0 : index
    %c0_4 = arith.constant 0 : index
    %2 = vector.load %arg3[%c0_3, %c0_4] : memref<1x256xf32, #tpu.memory_space<vmem>>, vector<1x256xf32>
    %3 = arith.truncf %0 : vector<16x3xf32> to vector<16x3xbf16>
    %cst = arith.constant dense<0.000000e+00> : vector<16x256xf32>
    %4 = tpu.matmul %3, %1, %cst {dimension_numbers = #tpu.dot_dimension_numbers<[1], [0], [0], [1], [0, 0, 1, 1], [], []>} : vector<16x3xbf16>, vector<3x256xbf16>, vector<16x256xf32> -> vector<16x256xf32>
    %5 = vector.broadcast %2 : vector<1x256xf32> to vector<16x256xf32>
    %6 = arith.addf %4, %5 : vector<16x256xf32>
    %cst_5 = arith.constant 0.000000e+00 : f32
    %7 = vector.broadcast %cst_5 : f32 to vector<16x256xf32>
    %8 = arith.maximumf %6, %7 : vector<16x256xf32>
    %c0_6 = arith.constant 0 : index
    %c0_7 = arith.constant 0 : index
    %9 = vector.load %arg4[%c0_6, %c0_7] : memref<256x256xbf16, #tpu.memory_space<vmem>>, vector<256x256xbf16>
    %c0_8 = arith.constant 0 : index
    %c0_9 = arith.constant 0 : index
    %10 = vector.load %arg5[%c0_8, %c0_9] : memref<1x256xf32, #tpu.memory_space<vmem>>, vector<1x256xf32>
    %11 = arith.truncf %8 : vector<16x256xf32> to vector<16x256xbf16>
    %cst_10 = arith.constant dense<0.000000e+00> : vector<16x256xf32>
    %12 = tpu.matmul %11, %9, %cst_10 {dimension_numbers = #tpu.dot_dimension_numbers<[1], [0], [0], [1], [0, 0, 1, 1], [], []>} : vector<16x256xbf16>, vector<256x256xbf16>, vector<16x256xf32> -> vector<16x256xf32>
    %13 = vector.broadcast %10 : vector<1x256xf32> to vector<16x256xf32>
    %14 = arith.addf %12, %13 : vector<16x256xf32>
    %cst_11 = arith.constant 0.000000e+00 : f32
    %15 = vector.broadcast %cst_11 : f32 to vector<16x256xf32>
    %16 = arith.maximumf %14, %15 : vector<16x256xf32>
    %c0_12 = arith.constant 0 : index
    %c0_13 = arith.constant 0 : index
    %17 = vector.load %arg6[%c0_12, %c0_13] : memref<256x256xbf16, #tpu.memory_space<vmem>>, vector<256x256xbf16>
    %c0_14 = arith.constant 0 : index
    %c0_15 = arith.constant 0 : index
    %18 = vector.load %arg7[%c0_14, %c0_15] : memref<1x256xf32, #tpu.memory_space<vmem>>, vector<1x256xf32>
    %19 = arith.truncf %16 : vector<16x256xf32> to vector<16x256xbf16>
    %cst_16 = arith.constant dense<0.000000e+00> : vector<16x256xf32>
    %20 = tpu.matmul %19, %17, %cst_16 {dimension_numbers = #tpu.dot_dimension_numbers<[1], [0], [0], [1], [0, 0, 1, 1], [], []>} : vector<16x256xbf16>, vector<256x256xbf16>, vector<16x256xf32> -> vector<16x256xf32>
    %21 = vector.broadcast %18 : vector<1x256xf32> to vector<16x256xf32>
    %22 = arith.addf %20, %21 : vector<16x256xf32>
    %cst_17 = arith.constant 0.000000e+00 : f32
    %23 = vector.broadcast %cst_17 : f32 to vector<16x256xf32>
    %24 = arith.maximumf %22, %23 : vector<16x256xf32>
    %c0_18 = arith.constant 0 : index
    %c0_19 = arith.constant 0 : index
    %25 = vector.load %arg8[%c0_18, %c0_19] : memref<256x256xbf16, #tpu.memory_space<vmem>>, vector<256x256xbf16>
    %c0_20 = arith.constant 0 : index
    %c0_21 = arith.constant 0 : index
    %26 = vector.load %arg9[%c0_20, %c0_21] : memref<1x256xf32, #tpu.memory_space<vmem>>, vector<1x256xf32>
    %27 = arith.truncf %24 : vector<16x256xf32> to vector<16x256xbf16>
    %cst_22 = arith.constant dense<0.000000e+00> : vector<16x256xf32>
    %28 = tpu.matmul %27, %25, %cst_22 {dimension_numbers = #tpu.dot_dimension_numbers<[1], [0], [0], [1], [0, 0, 1, 1], [], []>} : vector<16x256xbf16>, vector<256x256xbf16>, vector<16x256xf32> -> vector<16x256xf32>
    %29 = vector.broadcast %26 : vector<1x256xf32> to vector<16x256xf32>
    %30 = arith.addf %28, %29 : vector<16x256xf32>
    %cst_23 = arith.constant 0.000000e+00 : f32
    %31 = vector.broadcast %cst_23 : f32 to vector<16x256xf32>
    %32 = arith.maximumf %30, %31 : vector<16x256xf32>
    %c0_24 = arith.constant 0 : index
    %c0_25 = arith.constant 0 : index
    %33 = vector.load %arg10[%c0_24, %c0_25] : memref<256x256xbf16, #tpu.memory_space<vmem>>, vector<256x256xbf16>
    %c0_26 = arith.constant 0 : index
    %c0_27 = arith.constant 0 : index
    %34 = vector.load %arg11[%c0_26, %c0_27] : memref<1x256xf32, #tpu.memory_space<vmem>>, vector<1x256xf32>
    %35 = arith.truncf %32 : vector<16x256xf32> to vector<16x256xbf16>
    %cst_28 = arith.constant dense<0.000000e+00> : vector<16x256xf32>
    %36 = tpu.matmul %35, %33, %cst_28 {dimension_numbers = #tpu.dot_dimension_numbers<[1], [0], [0], [1], [0, 0, 1, 1], [], []>} : vector<16x256xbf16>, vector<256x256xbf16>, vector<16x256xf32> -> vector<16x256xf32>
    %37 = vector.broadcast %34 : vector<1x256xf32> to vector<16x256xf32>
    %38 = arith.addf %36, %37 : vector<16x256xf32>
    %cst_29 = arith.constant 0.000000e+00 : f32
    %39 = vector.broadcast %cst_29 : f32 to vector<16x256xf32>
    %40 = arith.maximumf %38, %39 : vector<16x256xf32>
    %c0_30 = arith.constant 0 : index
    %c0_31 = arith.constant 0 : index
    %41 = vector.load %arg12[%c0_30, %c0_31] : memref<256x256xbf16, #tpu.memory_space<vmem>>, vector<256x256xbf16>
    %c0_32 = arith.constant 0 : index
    %c0_33 = arith.constant 0 : index
    %42 = vector.load %arg13[%c0_32, %c0_33] : memref<1x256xf32, #tpu.memory_space<vmem>>, vector<1x256xf32>
    %43 = arith.truncf %40 : vector<16x256xf32> to vector<16x256xbf16>
    %cst_34 = arith.constant dense<0.000000e+00> : vector<16x256xf32>
    %44 = tpu.matmul %43, %41, %cst_34 {dimension_numbers = #tpu.dot_dimension_numbers<[1], [0], [0], [1], [0, 0, 1, 1], [], []>} : vector<16x256xbf16>, vector<256x256xbf16>, vector<16x256xf32> -> vector<16x256xf32>
    %45 = vector.broadcast %42 : vector<1x256xf32> to vector<16x256xf32>
    %46 = arith.addf %44, %45 : vector<16x256xf32>
    %cst_35 = arith.constant 0.000000e+00 : f32
    %47 = vector.broadcast %cst_35 : f32 to vector<16x256xf32>
    %48 = arith.maximumf %46, %47 : vector<16x256xf32>
    %c0_36 = arith.constant 0 : index
    %c0_37 = arith.constant 0 : index
    %49 = vector.load %arg14[%c0_36, %c0_37] : memref<256x256xbf16, #tpu.memory_space<vmem>>, vector<256x256xbf16>
    %c0_38 = arith.constant 0 : index
    %c0_39 = arith.constant 0 : index
    %50 = vector.load %arg15[%c0_38, %c0_39] : memref<1x256xf32, #tpu.memory_space<vmem>>, vector<1x256xf32>
    %51 = arith.truncf %48 : vector<16x256xf32> to vector<16x256xbf16>
    %cst_40 = arith.constant dense<0.000000e+00> : vector<16x256xf32>
    %52 = tpu.matmul %51, %49, %cst_40 {dimension_numbers = #tpu.dot_dimension_numbers<[1], [0], [0], [1], [0, 0, 1, 1], [], []>} : vector<16x256xbf16>, vector<256x256xbf16>, vector<16x256xf32> -> vector<16x256xf32>
    %53 = vector.broadcast %50 : vector<1x256xf32> to vector<16x256xf32>
    %54 = arith.addf %52, %53 : vector<16x256xf32>
    %cst_41 = arith.constant 0.000000e+00 : f32
    %55 = vector.broadcast %cst_41 : f32 to vector<16x256xf32>
    %56 = arith.maximumf %54, %55 : vector<16x256xf32>
    %c0_42 = arith.constant 0 : index
    %c0_43 = arith.constant 0 : index
    %57 = vector.load %arg16[%c0_42, %c0_43] : memref<256x256xbf16, #tpu.memory_space<vmem>>, vector<256x256xbf16>
    %c0_44 = arith.constant 0 : index
    %c0_45 = arith.constant 0 : index
    %58 = vector.load %arg17[%c0_44, %c0_45] : memref<1x256xf32, #tpu.memory_space<vmem>>, vector<1x256xf32>
    %59 = arith.truncf %56 : vector<16x256xf32> to vector<16x256xbf16>
    %cst_46 = arith.constant dense<0.000000e+00> : vector<16x256xf32>
    %60 = tpu.matmul %59, %57, %cst_46 {dimension_numbers = #tpu.dot_dimension_numbers<[1], [0], [0], [1], [0, 0, 1, 1], [], []>} : vector<16x256xbf16>, vector<256x256xbf16>, vector<16x256xf32> -> vector<16x256xf32>
    %61 = vector.broadcast %58 : vector<1x256xf32> to vector<16x256xf32>
    %62 = arith.addf %60, %61 : vector<16x256xf32>
    %cst_47 = arith.constant 0.000000e+00 : f32
    %63 = vector.broadcast %cst_47 : f32 to vector<16x256xf32>
    %64 = arith.maximumf %62, %63 : vector<16x256xf32>
    %c0_48 = arith.constant 0 : index
    %c0_49 = arith.constant 0 : index
    %65 = vector.load %arg18[%c0_48, %c0_49] : memref<256x4xbf16, #tpu.memory_space<vmem>>, vector<256x4xbf16>
    %c0_50 = arith.constant 0 : index
    %c0_51 = arith.constant 0 : index
    %66 = vector.load %arg19[%c0_50, %c0_51] : memref<1x4xf32, #tpu.memory_space<vmem>>, vector<1x4xf32>
    %67 = arith.truncf %64 : vector<16x256xf32> to vector<16x256xbf16>
    %cst_52 = arith.constant dense<0.000000e+00> : vector<16x4xf32>
    %68 = tpu.matmul %67, %65, %cst_52 {dimension_numbers = #tpu.dot_dimension_numbers<[1], [0], [0], [1], [0, 0, 1, 1], [], []>} : vector<16x256xbf16>, vector<256x4xbf16>, vector<16x4xf32> -> vector<16x4xf32>
    %69 = vector.broadcast %66 : vector<1x4xf32> to vector<16x4xf32>
    %70 = arith.addf %68, %69 : vector<16x4xf32>
    %c0_53 = arith.constant 0 : index
    %c0_54 = arith.constant 0 : index
    %71 = vector.load %arg20[%c0_53, %c0_54] : memref<16x4xf32, #tpu.memory_space<vmem>>, vector<16x4xf32>
    tpu.vector_store %arg20[%c0_53, %c0_54], %70 {strides = array<i32>} : memref<16x4xf32, #tpu.memory_space<vmem>>, vector<16x4xf32>,
    return
  }
  func.func @transform_0(%arg0: i32) -> (i32, i32) {
    %c0_i32 = arith.constant 0 : i32
    %c0_i32_0 = arith.constant 0 : i32
    return %arg0, %c0_i32 : i32, i32
  }
  func.func @transform_1(%arg0: i32) -> (i32, i32) {
    %c0_i32 = arith.constant 0 : i32
    %c0_i32_0 = arith.constant 0 : i32
    %c0_i32_1 = arith.constant 0 : i32
    return %c0_i32, %c0_i32_0 : i32, i32
  }
  func.func @transform_2(%arg0: i32) -> (i32, i32) {
    %c0_i32 = arith.constant 0 : i32
    %c0_i32_0 = arith.constant 0 : i32
    %c0_i32_1 = arith.constant 0 : i32
    return %c0_i32, %c0_i32_0 : i32, i32
  }
  func.func @transform_3(%arg0: i32) -> (i32, i32) {
    %c0_i32 = arith.constant 0 : i32
    %c0_i32_0 = arith.constant 0 : i32
    %c0_i32_1 = arith.constant 0 : i32
    return %c0_i32, %c0_i32_0 : i32, i32
  }
  func.func @transform_4(%arg0: i32) -> (i32, i32) {
    %c0_i32 = arith.constant 0 : i32
    %c0_i32_0 = arith.constant 0 : i32
    %c0_i32_1 = arith.constant 0 : i32
    return %c0_i32, %c0_i32_0 : i32, i32
  }
  func.func @transform_5(%arg0: i32) -> (i32, i32) {
    %c0_i32 = arith.constant 0 : i32
    %c0_i32_0 = arith.constant 0 : i32
    %c0_i32_1 = arith.constant 0 : i32
    return %c0_i32, %c0_i32_0 : i32, i32
  }
  func.func @transform_6(%arg0: i32) -> (i32, i32) {
    %c0_i32 = arith.constant 0 : i32
    %c0_i32_0 = arith.constant 0 : i32
    %c0_i32_1 = arith.constant 0 : i32
    return %c0_i32, %c0_i32_0 : i32, i32
  }
  func.func @transform_7(%arg0: i32) -> (i32, i32) {
    %c0_i32 = arith.constant 0 : i32
    %c0_i32_0 = arith.constant 0 : i32
    %c0_i32_1 = arith.constant 0 : i32
    return %c0_i32, %c0_i32_0 : i32, i32
  }
  func.func @transform_8(%arg0: i32) -> (i32, i32) {
    %c0_i32 = arith.constant 0 : i32
    %c0_i32_0 = arith.constant 0 : i32
    %c0_i32_1 = arith.constant 0 : i32
    return %c0_i32, %c0_i32_0 : i32, i32
  }
  func.func @transform_9(%arg0: i32) -> (i32, i32) {
    %c0_i32 = arith.constant 0 : i32
    %c0_i32_0 = arith.constant 0 : i32
    %c0_i32_1 = arith.constant 0 : i32
    return %c0_i32, %c0_i32_0 : i32, i32
  }
  func.func @transform_10(%arg0: i32) -> (i32, i32) {
    %c0_i32 = arith.constant 0 : i32
    %c0_i32_0 = arith.constant 0 : i32
    %c0_i32_1 = arith.constant 0 : i32
    return %c0_i32, %c0_i32_0 : i32, i32
  }
  func.func @transform_11(%arg0: i32) -> (i32, i32) {
    %c0_i32 = arith.constant 0 : i32
    %c0_i32_0 = arith.constant 0 : i32
    %c0_i32_1 = arith.constant 0 : i32
    return %c0_i32, %c0_i32_0 : i32, i32
  }
  func.func @transform_12(%arg0: i32) -> (i32, i32) {
    %c0_i32 = arith.constant 0 : i32
    %c0_i32_0 = arith.constant 0 : i32
    %c0_i32_1 = arith.constant 0 : i32
    return %c0_i32, %c0_i32_0 : i32, i32
  }
  func.func @transform_13(%arg0: i32) -> (i32, i32) {
    %c0_i32 = arith.constant 0 : i32
    %c0_i32_0 = arith.constant 0 : i32
    %c0_i32_1 = arith.constant 0 : i32
    return %c0_i32, %c0_i32_0 : i32, i32
  }
  func.func @transform_14(%arg0: i32) -> (i32, i32) {
    %c0_i32 = arith.constant 0 : i32
    %c0_i32_0 = arith.constant 0 : i32
    %c0_i32_1 = arith.constant 0 : i32
    return %c0_i32, %c0_i32_0 : i32, i32
  }
  func.func @transform_15(%arg0: i32) -> (i32, i32) {
    %c0_i32 = arith.constant 0 : i32
    %c0_i32_0 = arith.constant 0 : i32
    %c0_i32_1 = arith.constant 0 : i32
    return %c0_i32, %c0_i32_0 : i32, i32
  }
  func.func @transform_16(%arg0: i32) -> (i32, i32) {
    %c0_i32 = arith.constant 0 : i32
    %c0_i32_0 = arith.constant 0 : i32
    %c0_i32_1 = arith.constant 0 : i32
    return %c0_i32, %c0_i32_0 : i32, i32
  }
  func.func @transform_17(%arg0: i32) -> (i32, i32) {
    %c0_i32 = arith.constant 0 : i32
    %c0_i32_0 = arith.constant 0 : i32
    %c0_i32_1 = arith.constant 0 : i32
    return %c0_i32, %c0_i32_0 : i32, i32
  }
  func.func @transform_18(%arg0: i32) -> (i32, i32) {
    %c0_i32 = arith.constant 0 : i32
    %c0_i32_0 = arith.constant 0 : i32
    %c0_i32_1 = arith.constant 0 : i32
    return %c0_i32, %c0_i32_0 : i32, i32
  }
  func.func @transform_19(%arg0: i32) -> (i32, i32) {
    %c0_i32 = arith.constant 0 : i32
    %c0_i32_0 = arith.constant 0 : i32
    return %arg0, %c0_i32 : i32, i32
  }
}

</mosaic_0001>

<bundles_post_ra>
// kernel: nerf_forward.1
= control target key start
LH: loop header
LB: loop body
LE: loop exit
PB: predicated region body
PF: predicated region fallthrough
CT: control target
= control target key end

     0   :  { %s3860_s0 = inlined_call_operand.vmem [shape: f32[16,3], index: 0, kind: input, shape index: {}]   ;;  %s3861_s1 = inlined_call_operand.vmem [shape: bf16[3,256], index: 1, kind: input, shape index: {}]   ;;  %s3862_s2 = inlined_call_operand.vmem [shape: f32[1,256], index: 2, kind: input, shape index: {}]   ;;  %s3863_s3 = inlined_call_operand.hbm [shape: bf16[256,256], index: 3, kind: input, shape index: {}]   ;;  %s3864_s4 = inlined_call_operand.vmem [shape: f32[1,256], index: 4, kind: input, shape index: {}]   ;;  %s3865_s5 = inlined_call_operand.hbm [shape: bf16[256,256], index: 5, kind: input, shape index: {}]   ;;  %s3866_s6 = inlined_call_operand.vmem [shape: f32[1,256], index: 6, kind: input, shape index: {}]   ;;  %s3867_s7 = inlined_call_operand.hbm [shape: bf16[256,256], index: 7, kind: input, shape index: {}]   ;;  %s3868_s8 = inlined_call_operand.vmem [shape: f32[1,256], index: 8, kind: input, shape index: {}]   ;;  %s3869_s9 = inlined_call_operand.hbm [shape: bf16[256,256], index: 9, kind: input, shape index: {}]   ;;  %s3870_s10 = inlined_call_operand.vmem [shape: f32[1,256], index: 10, kind: input, shape index: {}]   ;;  %s3871_s11 = inlined_call_operand.hbm [shape: bf16[256,256], index: 11, kind: input, shape index: {}]   ;;  %s3872_s12 = inlined_call_operand.vmem [shape: f32[1,256], index: 12, kind: input, shape index: {}]   ;;  %s3873_s13 = inlined_call_operand.hbm [shape: bf16[256,256], index: 13, kind: input, shape index: {}]   ;;  %s3874_s14 = inlined_call_operand.vmem [shape: f32[1,256], index: 14, kind: input, shape index: {}]   ;;  %s3875_s15 = inlined_call_operand.hbm [shape: bf16[256,256], index: 15, kind: input, shape index: {}]   ;;  %s3876_s16 = inlined_call_operand.vmem [shape: f32[1,256], index: 16, kind: input, shape index: {}]   ;;  %s3877_s17 = inlined_call_operand.hbm [shape: bf16[256,4], index: 17, kind: input, shape index: {}]   ;;  %s3878_s18 = inlined_call_operand.vmem [shape: f32[1,4], index: 18, kind: input, shape index: {}]   ;;  %s3879_s19 = inlined_call_operand.vmem [shape: f32[16,4], index: 19, kind: output, shape index: {}]  }
   0x1   :  { %3881 = sst [smem:[#allocation20_spill]] %s3860_s0 }
   0x2   :  { %3882 = sst [smem:[#allocation21_spill]] %s3861_s1 }
   0x3   :  { %3883 = sst [smem:[#allocation22_spill]] %s3862_s2 }
   0x4   :  { %3884 = sst [smem:[#allocation23_spill]] %s3863_s3 }
   0x5   :  { %24 = vsyncpa [#allocation3], 0 }
   0x6   :  { %25 = vsyncpa [#allocation5], 0 }
   0x7   :  { %26 = vsyncpa [#allocation8], 0 }
   0x8   :  { %27 = vsyncpa [#allocation11], 0 }
   0x9   :  { %28 = vsyncpa [#allocation14], 0  ;;  %s54_s20 = sshll.u32 %s3865_s5, 4  ;;  %s3658_s21 = smov [#allocation4]   ;;  %s55_s20 = int_to_ptr.hbm [resolvable:$true] %s54_s20 }
   0xa   :  { %s56_s1 = sshll.u32 %s3658_s21, 4  ;;  %s84_s23 = sshll.u32 %s3869_s9, 4  ;;  %s57_s1 = int_to_ptr.vmem [resolvable:$true] %s56_s1  ;;  %s85_s23 = int_to_ptr.hbm [resolvable:$true] %s84_s23 }
   0xb   :  { %s3659_s24 = smov 128   ;;  %s3660_s25 = smov 8  }
   0xc   :  { %62 = dma.hbm_to_vmem [thread:$0]  %s55_s20, 4096, %s57_s1, [#allocation5], %s3659_s24, %s3659_s24, %s3660_s25  }
   0xd   :  { %s3661_s3 = smov [#allocation7]   ;;  %s114_s5 = sshll.u32 %s3873_s13, 4  ;;  %s115_s5 = int_to_ptr.hbm [resolvable:$true] %s114_s5 }
   0xe   :  { %s86_s26 = sshll.u32 %s3661_s3, 4  ;;  %s3885_s0 = sld [smem:[#allocation23_spill]]  ;;  %s87_s26 = int_to_ptr.vmem [resolvable:$true] %s86_s26 }
   0xf   :  { %92 = dma.hbm_to_vmem [thread:$0]  %s85_s23, 4096, %s87_s26, [#allocation8], %s3659_s24, %s3659_s24, %s3660_s25  }
  0x10   :  { %s3662_s21 = smov [#allocation10]   ;;  %s3663_s20 = smov [#allocation2]  }
  0x11   :  { %s116_s22 = sshll.u32 %s3662_s21, 4  ;;  %s41_s13 = sshll.u32 %s3663_s20, 4  ;;  %s117_s22 = int_to_ptr.vmem [resolvable:$true] %s116_s22  ;;  %s42_s13 = int_to_ptr.vmem [resolvable:$true] %s41_s13 }
  0x12   :  { %122 = dma.hbm_to_vmem [thread:$0]  %s115_s5, 4096, %s117_s22, [#allocation11], %s3659_s24, %s3659_s24, %s3660_s25  }
  0x13   :  { %s69_s3 = sshll.u32 %s3867_s7, 4  ;;  %s99_s27 = sshll.u32 %s3871_s11, 4  ;;  %s70_s3 = int_to_ptr.hbm [resolvable:$true] %s69_s3  ;;  %s100_s27 = int_to_ptr.hbm [resolvable:$true] %s99_s27 }
  0x14   :  { %s39_s30 = sshll.u32 %s3885_s0, 4  ;;  %s3664_s28 = smov [#allocation6]   ;;  %s40_s30 = int_to_ptr.hbm [resolvable:$true] %s39_s30 }
  0x15   :  { %47 = dma.hbm_to_vmem [thread:$0]  %s40_s30, 4096, %s42_s13, [#allocation3], %s3659_s24, %s3659_s24, %s3660_s25  }
  0x16   :  { %s71_s9 = sshll.u32 %s3664_s28, 4  ;;  %s3665_s5 = smov [#allocation9]   ;;  %s72_s9 = int_to_ptr.vmem [resolvable:$true] %s71_s9 }
  0x17   :  { %77 = dma.hbm_to_vmem [thread:$0]  %s70_s3, 4096, %s72_s9, [#allocation5], %s3659_s24, %s3659_s24, %s3660_s25  }
  0x18   :  { %s101_s7 = sshll.u32 %s3665_s5, 4  ;;  %s129_s21 = sshll.u32 %s3875_s15, 4  ;;  %s102_s7 = int_to_ptr.vmem [resolvable:$true] %s101_s7  ;;  %s130_s21 = int_to_ptr.hbm [resolvable:$true] %s129_s21 }
  0x19   :  { %107 = dma.hbm_to_vmem [thread:$0]  %s100_s27, 4096, %s102_s7, [#allocation8], %s3659_s24, %s3659_s24, %s3660_s25  }
  0x1a   :  { %s144_s22 = sshll.u32 %s3877_s17, 4  ;;  %s3666_s20 = smov [#allocation12]   ;;  %s145_s22 = int_to_ptr.hbm [resolvable:$true] %s144_s22 }
  0x1b   :  { %s131_s13 = sshll.u32 %s3666_s20, 4  ;;  %s3667_s1 = smov [#allocation13]   ;;  %s132_s13 = int_to_ptr.vmem [resolvable:$true] %s131_s13 }
  0x1c   :  { %137 = dma.hbm_to_vmem [thread:$0]  %s130_s21, 4096, %s132_s13, [#allocation11], %s3659_s24, %s3659_s24, %s3660_s25  }
  0x1d   :  { %s146_s15 = sshll.u32 %s3667_s1, 4  ;;  %s3668_s2 = smov 64   ;;  %s147_s15 = int_to_ptr.vmem [resolvable:$true] %s146_s15 }
  0x1e   :  { %s3669_s3 = smov 4  }
  0x1f   :  { %152 = dma.hbm_to_vmem [thread:$0]  %s145_s22, 2048, %s147_s15, [#allocation14], %s3668_s2, %s3668_s2, %s3669_s3  }
  0x20   :  { %3648 = dma.done.wait [#allocation3], 4096  }
  0x21   :  { %3649 = vsyncadd [#allocation3], 4294963200 }
  0x22   :  { %3650 = dma.done.wait [#allocation5], 8192  }
  0x23   :  { %3651 = vsyncadd [#allocation5], 4294959104 }
  0x24   :  { %3652 = dma.done.wait [#allocation8], 8192  }
  0x25   :  { %3653 = vsyncadd [#allocation8], 4294959104 }
  0x26   :  { %3654 = dma.done.wait [#allocation11], 8192  }
  0x27   :  { %3655 = vsyncadd [#allocation11], 4294959104 }
  0x28   :  { %3656 = dma.done.wait [#allocation14], 2048  }
  0x29   :  { %3657 = vsyncadd [#allocation14], 4294965248  ;;  %s3886_s26 = sld [smem:[#allocation21_spill]]  ;;  %vm206_vm0 = vcmask 1040384   ;;  %v2300_v1 = vld [vmem:[#allocation2 + $0x70] sm:$0xf] }
  0x2a   :  { %v3217_v2 = vld [vmem:[#allocation2 + $0x74] sm:$0xf0]  ;;  %v2364_v4 = vld [vmem:[#allocation2 + $0xf0] sm:$0xf]  ;;  %vm207_vm1 = vcmask 1041408   ;;  %v3670_v6 = vmov 65535  }
  0x2b   :  { %v2301_v3 = vor.u32 %v3217_v2, %v2300_v1  ;;  %v3233_v5 = vld [vmem:[#allocation2 + $0xf4] sm:$0xf0]  ;;  %v208_v7 = vsel %vm206_vm0, 4294967295, %v3670_v6  ;;  %v3216_v9 = vld [vmem:[#allocation2 + $0x74] sm:$0xf]  ;;  %s3887_s27 = sld [smem:[#allocation20_spill]] }
  0x2c   :  { %v2365_v8 = vor.u32 %v3233_v5, %v2364_v4  ;;  %v2302_v10 = vld [vmem:[#allocation2 + $0x78] sm:$0xf0]  ;;  %v2292_v11 = vld [vmem:[#allocation2 + $0x60] sm:$0xf]  ;;  %v3215_v12 = vld [vmem:[#allocation2 + $0x64] sm:$0xf0] }
  0x2d   :  { %446 = vmatpush.bf16.msra.mxu2 %v2301_v3  ;;  %v2356_v13 = vld [vmem:[#allocation2 + $0xe0] sm:$0xf]  ;;  %v3232_v14 = vld [vmem:[#allocation2 + $0xf4] sm:$0xf]  ;;  %v2366_v15 = vld [vmem:[#allocation2 + $0xf8] sm:$0xf0]  ;;  %v2293_v16 = vor.u32 %v3215_v12, %v2292_v11  ;;  %v2305_v29 = vor.u32 %v3216_v9, %v2302_v10 }
  0x2e   :  { %460 = vmatpush.bf16.msra.mxu3 %v2365_v8  ;;  %v3231_v17 = vld [vmem:[#allocation2 + $0xe4] sm:$0xf0]  ;;  %v209_v18 = vsel %vm207_vm1, %v208_v7, 0  ;;  %v2284_v22 = vld [vmem:[#allocation2 + $0x50] sm:$0xf]  ;;  %v2369_v30 = vor.u32 %v3232_v14, %v2366_v15  ;;  %vm202_vm2 = vcmask 23552  }
  0x2f   :  { %v190_v0 = vld [vmem:[%s3886_s26] sm:$0xf]  ;;  %v2357_v21 = vor.u32 %v3231_v17, %v2356_v13  ;;  %v3214_v23 = vld [vmem:[#allocation2 + $0x64] sm:$0xf]  ;;  %v2348_v25 = vld [vmem:[#allocation2 + $0xd0] sm:$0xf] }
  0x30   :  { %199 = vst [vmem:[#allocation1] ss:$4 sm:$0xff] %v190_v0  ;;  %v3213_v24 = vld [vmem:[#allocation2 + $0x54] sm:$0xf0]  ;;  %v2294_v33 = vld [vmem:[#allocation2 + $0x68] sm:$0xf0] }
  0x31   :  { %v188_v19 = vld [vmem:[%s3887_s27] sm:$0xff]  ;;  %v189_v20 = vld [vmem:[%s3887_s27 + $0x8] sm:$0xff]  ;;  %447 = vmatpush.bf16.msra.mxu2 %v2293_v16  ;;  %v2358_v35 = vld [vmem:[#allocation2 + $0xe8] sm:$0xf0]  ;;  %v2285_v36 = vor.u32 %v3213_v24, %v2284_v22  ;;  %v2297_v43 = vor.u32 %v3214_v23, %v2294_v33  ;;  %s3888_s29 = sld [smem:[#allocation22_spill]]  ;;  %vm2228_vm3 = vcmask 31744  }
  0x32   :  { %v3229_v26 = vld [vmem:[#allocation2 + $0xd4] sm:$0xf0]  ;;  %461 = vmatpush.bf16.msra.mxu3 %v2357_v21  ;;  %v3230_v34 = vld [vmem:[#allocation2 + $0xe4] sm:$0xf]  ;;  %v192_v38 = vpack.c.bf16 %v189_v20, %v188_v19  ;;  %v2276_v39 = vld [vmem:[#allocation2 + $0x40] sm:$0xf] }
  0x33   :  { %v2349_v37 = vor.u32 %v3229_v26, %v2348_v25  ;;  %v3211_v40 = vld [vmem:[#allocation2 + $0x44] sm:$0xf0]  ;;  %v2340_v41 = vld [vmem:[#allocation2 + $0xc0] sm:$0xf]  ;;  %v2361_v44 = vor.u32 %v3230_v34, %v2358_v35  ;;  %v3212_v45 = vld [vmem:[#allocation2 + $0x54] sm:$0xf] }
  0x34   :  { %v3227_v42 = vld [vmem:[#allocation2 + $0xc4] sm:$0xf0]  ;;  %v2286_v46 = vld [vmem:[#allocation2 + $0x58] sm:$0xf0]  ;;  %v3228_v47 = vld [vmem:[#allocation2 + $0xd4] sm:$0xf]  ;;  %v2277_v49 = vor.u32 %v3211_v40, %v2276_v39 }
  0x35   :  { %448 = vmatpush.bf16.msra.mxu2 %v2285_v36  ;;  %v2350_v48 = vld [vmem:[#allocation2 + $0xd8] sm:$0xf0]  ;;  %v2341_v50 = vor.u32 %v3227_v42, %v2340_v41  ;;  %v2289_v51 = vor.u32 %v3212_v45, %v2286_v46  ;;  %v3210_v53 = vld [vmem:[#allocation2 + $0x44] sm:$0xf]  ;;  %v2278_v54 = vld [vmem:[#allocation2 + $0x48] sm:$0xf0] }
  0x36   :  { %462 = vmatpush.bf16.msra.mxu3 %v2349_v37  ;;  %v2353_v52 = vor.u32 %v3228_v47, %v2350_v48  ;;  %v3226_v55 = vld [vmem:[#allocation2 + $0xc4] sm:$0xf]  ;;  %v2342_v56 = vld [vmem:[#allocation2 + $0xc8] sm:$0xf0]  ;;  %v2281_v57 = vor.u32 %v3210_v53, %v2278_v54  ;;  %v2268_v59 = vld [vmem:[#allocation2 + $0x30] sm:$0xf] }
  0x37   :  { %v200_v27 = vld.sshfl [vmem:[#allocation1] sm:$0xff pattern:$0x73625140]  ;;  %v201_v28 = vld.sshfl [vmem:[#allocation1 + $0x8] sm:$0xff pattern:$0x73625140]  ;;  %v2345_v58 = vor.u32 %v3226_v55, %v2342_v56 }
  0x38   :  { %v210_v31 = vand.u32 %v209_v18, %v200_v27  ;;  %v212_v32 = vand.u32 %v209_v18, %v201_v28  ;;  %v3209_v60 = vld [vmem:[#allocation2 + $0x34] sm:$0xf0]  ;;  %v2332_v61 = vld [vmem:[#allocation2 + $0xb0] sm:$0xf]  ;;  %v3208_v0 = vld [vmem:[#allocation2 + $0x34] sm:$0xf] }
  0x39   :  { %449 = vmatpush.bf16.msra.mxu2 %v2277_v49  ;;  %v2269_v62 = vor.u32 %v3209_v60, %v2268_v59  ;;  %v3225_v63 = vld [vmem:[#allocation2 + $0xb4] sm:$0xf0]  ;;  %v2270_v1 = vld [vmem:[#allocation2 + $0x38] sm:$0xf0]  ;;  %v3224_v4 = vld [vmem:[#allocation2 + $0xb4] sm:$0xf] }
  0x3a   :  { %221 = vmatpush.bf16.msra.mxu0 %v210_v31  ;;  %235 = vmatpush.bf16.msra.mxu1 %v212_v32  ;;  %v2333_v2 = vor.u32 %v3225_v63, %v2332_v61  ;;  %v2273_v3 = vor.u32 %v3208_v0, %v2270_v1  ;;  %v2334_v5 = vld [vmem:[#allocation2 + $0xb8] sm:$0xf0]  ;;  %v2260_v7 = vld [vmem:[#allocation2 + $0x20] sm:$0xf]  ;;  %v3207_v8 = vld [vmem:[#allocation2 + $0x24] sm:$0xf0] }
  0x3b   :  { %463 = vmatpush.bf16.msra.mxu3 %v2341_v50  ;;  %v2337_v6 = vor.u32 %v3224_v4, %v2334_v5  ;;  %v2261_v9 = vor.u32 %v3207_v8, %v2260_v7  ;;  %v2324_v10 = vld [vmem:[#allocation2 + $0xa0] sm:$0xf]  ;;  %v3223_v11 = vld [vmem:[#allocation2 + $0xa4] sm:$0xf0]  ;;  %v3206_v12 = vld [vmem:[#allocation2 + $0x24] sm:$0xf] }
  0x3c   :  { %v2325_v13 = vor.u32 %v3223_v11, %v2324_v10  ;;  %v2262_v14 = vld [vmem:[#allocation2 + $0x28] sm:$0xf0]  ;;  %v3222_v15 = vld [vmem:[#allocation2 + $0xa4] sm:$0xf]  ;;  %v2252_v19 = vld [vmem:[#allocation2 + $0x10] sm:$0xf] }
  0x3d   :  { %2240 = vmatmul.msk.bf16.vlgmr.msra.gmra.mxu0 %vm202_vm2, %v192_v38  ;;  %2241 = vmatmul.msk.bf16.vlgmr.msra.gmra.mxu1 %vm202_vm2, %v192_v38  ;;  %v2326_v16 = vld [vmem:[#allocation2 + $0xa8] sm:$0xf0]  ;;  %v2265_v17 = vor.u32 %v3206_v12, %v2262_v14  ;;  %v3205_v20 = vld [vmem:[#allocation2 + $0x14] sm:$0xf0]  ;;  %v2316_v21 = vld [vmem:[#allocation2 + $0x90] sm:$0xf] }
  0x3e   :  { %474 = vmatpush.bf16.msrb.mxu0 %v2305_v29  ;;  %488 = vmatpush.bf16.msrb.mxu1 %v2369_v30  ;;  %v2329_v18 = vor.u32 %v3222_v15, %v2326_v16  ;;  %v2253_v22 = vor.u32 %v3205_v20, %v2252_v19  ;;  %v3221_v23 = vld [vmem:[#allocation2 + $0x94] sm:$0xf0]  ;;  %v3204_v24 = vld [vmem:[#allocation2 + $0x14] sm:$0xf]  ;;  %v2254_v25 = vld [vmem:[#allocation2 + $0x18] sm:$0xf0] }
  0x3f   :  { %450 = vmatpush.bf16.msra.mxu2 %v2269_v62  ;;  %464 = vmatpush.bf16.msra.mxu3 %v2333_v2  ;;  %v2317_v26 = vor.u32 %v3221_v23, %v2316_v21  ;;  %v2257_v27 = vor.u32 %v3204_v24, %v2254_v25  ;;  %v3220_v28 = vld [vmem:[#allocation2 + $0x94] sm:$0xf]  ;;  %v2318_v29 = vld [vmem:[#allocation2 + $0x98] sm:$0xf0]  ;;  %v2244_v31 = vld [vmem:[#allocation2] sm:$0xf] }
  0x40   :  { %v2321_v30 = vor.u32 %v3220_v28, %v2318_v29  ;;  %v3203_v32 = vld [vmem:[#allocation2 + $0x4] sm:$0xf0]  ;;  %v2308_v33 = vld [vmem:[#allocation2 + $0x80] sm:$0xf]  ;;  %v3202_v36 = vld [vmem:[#allocation2 + $0x4] sm:$0xf] }
  0x41   :  { %v2245_v34 = vor.u32 %v3203_v32, %v2244_v31  ;;  %v3219_v35 = vld [vmem:[#allocation2 + $0x84] sm:$0xf0]  ;;  %v2246_v37 = vld [vmem:[#allocation2 + $0x8] sm:$0xf0]  ;;  %v3218_v40 = vld [vmem:[#allocation2 + $0x84] sm:$0xf] }
  0x42   :  { %475 = vmatpush.bf16.msrb.mxu0 %v2297_v43  ;;  %489 = vmatpush.bf16.msrb.mxu1 %v2361_v44  ;;  %v2309_v38 = vor.u32 %v3219_v35, %v2308_v33  ;;  %v2249_v39 = vor.u32 %v3202_v36, %v2246_v37  ;;  %v2310_v41 = vld [vmem:[#allocation2 + $0x88] sm:$0xf0]  ;;  %v2492_v43 = vld [vmem:[#allocation4 + $0xf0] sm:$0xf]  ;;  %v3265_v44 = vld [vmem:[#allocation4 + $0xf4] sm:$0xf0] }
  0x43   :  { %451 = vmatpush.bf16.msra.mxu2 %v2261_v9  ;;  %465 = vmatpush.bf16.msra.mxu3 %v2325_v13  ;;  %v2313_v42 = vor.u32 %v3218_v40, %v2310_v41  ;;  %v3264_v45 = vld [vmem:[#allocation4 + $0xf4] sm:$0xf]  ;;  %v2493_v46 = vor.u32 %v3265_v44, %v2492_v43  ;;  %v2494_v47 = vld [vmem:[#allocation4 + $0xf8] sm:$0xf0]  ;;  %v2484_v48 = vld [vmem:[#allocation4 + $0xe0] sm:$0xf] }
  0x44   :  { %v3263_v49 = vld [vmem:[#allocation4 + $0xe4] sm:$0xf0]  ;;  %v2497_v50 = vor.u32 %v3264_v45, %v2494_v47  ;;  %v2428_v53 = vld [vmem:[#allocation4 + $0x70] sm:$0xf]  ;;  %v3249_v55 = vld [vmem:[#allocation4 + $0x74] sm:$0xf0] }
  0x45   :  { %v2485_v54 = vor.u32 %v3263_v49, %v2484_v48  ;;  %v3248_v56 = vld [vmem:[#allocation4 + $0x74] sm:$0xf]  ;;  %v2429_v59 = vor.u32 %v3249_v55, %v2428_v53  ;;  %v2476_v61 = vld [vmem:[#allocation4 + $0xd0] sm:$0xf]  ;;  %v3261_v62 = vld [vmem:[#allocation4 + $0xd4] sm:$0xf0] }
  0x46   :  { %476 = vmatpush.bf16.msrb.mxu0 %v2289_v51  ;;  %490 = vmatpush.bf16.msrb.mxu1 %v2353_v52  ;;  %v3262_v51 = vld [vmem:[#allocation4 + $0xe4] sm:$0xf]  ;;  %v2486_v52 = vld [vmem:[#allocation4 + $0xe8] sm:$0xf0]  ;;  %v3260_v63 = vld [vmem:[#allocation4 + $0xd4] sm:$0xf] }
  0x47   :  { %452 = vmatpush.bf16.msra.mxu2 %v2253_v22  ;;  %466 = vmatpush.bf16.msra.mxu3 %v2317_v26  ;;  %v2478_v0 = vld [vmem:[#allocation4 + $0xd8] sm:$0xf0]  ;;  %v2420_v1 = vld [vmem:[#allocation4 + $0x60] sm:$0xf]  ;;  %v3247_v2 = vld [vmem:[#allocation4 + $0x64] sm:$0xf0] }
  0x48   :  { %v3246_v4 = vld [vmem:[#allocation4 + $0x64] sm:$0xf]  ;;  %v2422_v5 = vld [vmem:[#allocation4 + $0x68] sm:$0xf0]  ;;  %v2481_v8 = vor.u32 %v3260_v63, %v2478_v0  ;;  %v2468_v9 = vld [vmem:[#allocation4 + $0xc0] sm:$0xf] }
  0x49   :  { %v2425_v7 = vor.u32 %v3246_v4, %v2422_v5  ;;  %v3259_v10 = vld [vmem:[#allocation4 + $0xc4] sm:$0xf0]  ;;  %v3258_v11 = vld [vmem:[#allocation4 + $0xc4] sm:$0xf]  ;;  %v2470_v12 = vld [vmem:[#allocation4 + $0xc8] sm:$0xf0] }
  0x4a   :  { %477 = vmatpush.bf16.msrb.mxu0 %v2281_v57  ;;  %491 = vmatpush.bf16.msrb.mxu1 %v2345_v58  ;;  %v2430_v57 = vld [vmem:[#allocation4 + $0x78] sm:$0xf0]  ;;  %v2489_v58 = vor.u32 %v3262_v51, %v2486_v52  ;;  %v2469_v13 = vor.u32 %v3259_v10, %v2468_v9  ;;  %v2473_v14 = vor.u32 %v3258_v11, %v2470_v12  ;;  %v191_v15 = vld [vmem:[%s3888_s29] sm:$0x3]  ;;  %v2412_v32 = vld [vmem:[#allocation4 + $0x50] sm:$0xf] }
  0x4b   :  { %453 = vmatpush.bf16.msra.mxu2 %v2245_v34  ;;  %467 = vmatpush.bf16.msra.mxu3 %v2309_v38  ;;  %v2433_v60 = vor.u32 %v3248_v56, %v2430_v57  ;;  %v195_v19 = vperm.slane %v191_v15, 1  ;;  %v3245_v33 = vld [vmem:[#allocation4 + $0x54] sm:$0xf0]  ;;  %v3244_v34 = vld [vmem:[#allocation4 + $0x54] sm:$0xf] }
  0x4c   :  { %v2413_v35 = vor.u32 %v3245_v33, %v2412_v32  ;;  %v2414_v36 = vld [vmem:[#allocation4 + $0x58] sm:$0xf0]  ;;  %v2460_v38 = vld [vmem:[#allocation4 + $0xb0] sm:$0xf]  ;;  %v3256_v40 = vld [vmem:[#allocation4 + $0xb4] sm:$0xf] }
  0x4d   :  { %v2417_v37 = vor.u32 %v3244_v34, %v2414_v36  ;;  %v2404_v44 = vld [vmem:[#allocation4 + $0x40] sm:$0xf]  ;;  %v3243_v45 = vld [vmem:[#allocation4 + $0x44] sm:$0xf0]  ;;  %v2406_v48 = vld [vmem:[#allocation4 + $0x48] sm:$0xf0] }
  0x4e   :  { %478 = vmatpush.bf16.msrb.mxu0 %v2273_v3  ;;  %492 = vmatpush.bf16.msrb.mxu1 %v2337_v6  ;;  %v2421_v3 = vor.u32 %v3247_v2, %v2420_v1  ;;  %v2477_v6 = vor.u32 %v3261_v62, %v2476_v61  ;;  %v2405_v47 = vor.u32 %v3243_v45, %v2404_v44  ;;  %v3255_v51 = vld [vmem:[#allocation4 + $0xa4] sm:$0xf0]  ;;  %v3254_v52 = vld [vmem:[#allocation4 + $0xa4] sm:$0xf]  ;;  %v2396_v56 = vld [vmem:[#allocation4 + $0x30] sm:$0xf] }
  0x4f   :  { %720 = vmatpush.bf16.msrb.mxu3 %v2493_v46  ;;  %706 = vmatpush.bf16.msrb.mxu2 %v2429_v59  ;;  %v3242_v46 = vld [vmem:[#allocation4 + $0x44] sm:$0xf]  ;;  %v3241_v57 = vld [vmem:[#allocation4 + $0x34] sm:$0xf0]  ;;  %v3240_v59 = vld [vmem:[#allocation4 + $0x34] sm:$0xf] }
  0x50   :  { %v2409_v49 = vor.u32 %v3242_v46, %v2406_v48  ;;  %v2444_v62 = vld [vmem:[#allocation4 + $0x90] sm:$0xf]  ;;  %v3253_v63 = vld [vmem:[#allocation4 + $0x94] sm:$0xf0]  ;;  %v3252_v0 = vld [vmem:[#allocation4 + $0x94] sm:$0xf] }
  0x51   :  { %v2445_v1 = vor.u32 %v3253_v63, %v2444_v62  ;;  %v2446_v2 = vld [vmem:[#allocation4 + $0x98] sm:$0xf0]  ;;  %v2388_v4 = vld [vmem:[#allocation4 + $0x20] sm:$0xf]  ;;  %v3239_v5 = vld [vmem:[#allocation4 + $0x24] sm:$0xf0] }
  0x52   :  { %479 = vmatpush.bf16.msrb.mxu0 %v2265_v17  ;;  %493 = vmatpush.bf16.msrb.mxu1 %v2329_v18  ;;  %v194_v18 = vperm.slane %v191_v15, 0  ;;  %v2436_v10 = vld [vmem:[#allocation4 + $0x80] sm:$0xf]  ;;  %v3251_v11 = vld [vmem:[#allocation4 + $0x84] sm:$0xf0] }
  0x53   :  { %721 = vmatpush.bf16.msrb.mxu3 %v2485_v54  ;;  %707 = vmatpush.bf16.msrb.mxu2 %v2421_v3  ;;  %v2454_v54 = vld [vmem:[#allocation4 + $0xa8] sm:$0xf0]  ;;  %v2449_v3 = vor.u32 %v3252_v0, %v2446_v2  ;;  %v3250_v12 = vld [vmem:[#allocation4 + $0x84] sm:$0xf]  ;;  %v2622_v32 = vld [vmem:[#allocation6 + $0xf8] sm:$0xf0] }
  0x54   :  { %v2457_v55 = vor.u32 %v3254_v52, %v2454_v54  ;;  %v2612_v33 = vld [vmem:[#allocation6 + $0xe0] sm:$0xf]  ;;  %v3295_v34 = vld [vmem:[#allocation6 + $0xe4] sm:$0xf0]  ;;  %v3294_v36 = vld [vmem:[#allocation6 + $0xe4] sm:$0xf] }
  0x55   :  { %v278_v46 = vld [vmem:[%s3864_s4] sm:$0x3] }
  0x56   :  { %480 = vmatpush.bf16.msrb.mxu0 %v2257_v27  ;;  %494 = vmatpush.bf16.msrb.mxu1 %v2321_v30 }
  0x57   :  { %722 = vmatpush.bf16.msrb.mxu3 %v2477_v6  ;;  %708 = vmatpush.bf16.msrb.mxu2 %v2413_v35  ;;  %v3238_v6 = vld [vmem:[#allocation4 + $0x24] sm:$0xf] }
  0x5a   :  { %481 = vmatpush.bf16.msrb.mxu0 %v2249_v39  ;;  %495 = vmatpush.bf16.msrb.mxu1 %v2313_v42  ;;  %v3257_v39 = vld [vmem:[#allocation4 + $0xb4] sm:$0xf0]  ;;  %v2462_v42 = vld [vmem:[#allocation4 + $0xb8] sm:$0xf0] }
  0x5b   :  { %723 = vmatpush.bf16.msrb.mxu3 %v2469_v13  ;;  %v2461_v41 = vor.u32 %v3257_v39, %v2460_v38  ;;  %v2465_v43 = vor.u32 %v3256_v40, %v2462_v42  ;;  %709 = vmatpush.bf16.msrb.mxu2 %v2405_v47  ;;  %v2437_v13 = vor.u32 %v3251_v11, %v2436_v10  ;;  %v2556_v38 = vld [vmem:[#allocation6 + $0x70] sm:$0xf]  ;;  %v3281_v40 = vld [vmem:[#allocation6 + $0x74] sm:$0xf0]  ;;  %v2558_v42 = vld [vmem:[#allocation6 + $0x78] sm:$0xf0] }
  0x5c   :  { %v2613_v39 = vor.u32 %v3295_v34, %v2612_v33  ;;  %v2557_v44 = vor.u32 %v3281_v40, %v2556_v38  ;;  %v2606_v11 = vld [vmem:[#allocation6 + $0xd8] sm:$0xf0]  ;;  %v3288_v34 = vld [vmem:[#allocation6 + $0xb4] sm:$0xf]  ;;  %v3275_v38 = vld [vmem:[#allocation6 + $0x44] sm:$0xf0] }
  0x5e   :  { %748 = vmatpush.bf16.msra.mxu1 %v2497_v50  ;;  %734 = vmatpush.bf16.msra.mxu0 %v2433_v60  ;;  %v2452_v50 = vld [vmem:[#allocation4 + $0xa0] sm:$0xf]  ;;  %v2398_v60 = vld [vmem:[#allocation4 + $0x38] sm:$0xf0] }
  0x5f   :  { %724 = vmatpush.bf16.msrb.mxu3 %v2461_v41  ;;  %v2453_v53 = vor.u32 %v3255_v51, %v2452_v50  ;;  %v2401_v61 = vor.u32 %v3240_v59, %v2398_v60  ;;  %v3280_v41 = vld [vmem:[#allocation6 + $0x74] sm:$0xf] }
  0x60   :  { %v2561_v45 = vor.u32 %v3280_v41, %v2558_v42  ;;  %v2534_v41 = vld [vmem:[#allocation6 + $0x48] sm:$0xf0] }
  0x62   :  { %749 = vmatpush.bf16.msra.mxu1 %v2489_v58  ;;  %735 = vmatpush.bf16.msra.mxu0 %v2425_v7  ;;  %v2397_v58 = vor.u32 %v3241_v57, %v2396_v56  ;;  %v2389_v7 = vor.u32 %v3239_v5, %v2388_v4 }
  0x63   :  { %725 = vmatpush.bf16.msrb.mxu3 %v2453_v53  ;;  %v282_v53 = vperm.slane %v278_v46, 0 }
  0x64   :  { %710 = vmatpush.bf16.msrb.mxu2 %v2397_v58 }
  0x66   :  { %750 = vmatpush.bf16.msra.mxu1 %v2481_v8  ;;  %736 = vmatpush.bf16.msra.mxu0 %v2417_v37  ;;  %v2390_v8 = vld [vmem:[#allocation4 + $0x28] sm:$0xf0] }
  0x67   :  { %726 = vmatpush.bf16.msrb.mxu3 %v2445_v1  ;;  %v2393_v9 = vor.u32 %v3238_v6, %v2390_v8  ;;  %v2614_v37 = vld [vmem:[#allocation6 + $0xe8] sm:$0xf0]  ;;  %v3293_v8 = vld [vmem:[#allocation6 + $0xd4] sm:$0xf0] }
  0x68   :  { %711 = vmatpush.bf16.msrb.mxu2 %v2389_v7  ;;  %v2604_v7 = vld [vmem:[#allocation6 + $0xd0] sm:$0xf] }
  0x69   :  { %v2605_v10 = vor.u32 %v3293_v8, %v2604_v7  ;;  %v2566_v7 = vld [vmem:[#allocation6 + $0x88] sm:$0xf0] }
  0x6a   :  { %751 = vmatpush.bf16.msra.mxu1 %v2473_v14  ;;  %737 = vmatpush.bf16.msra.mxu0 %v2409_v49  ;;  %v2438_v14 = vld [vmem:[#allocation4 + $0x88] sm:$0xf0]  ;;  %v283_v49 = vperm.slane %v278_v46, 1 }
  0x6b   :  { %v2441_v15 = vor.u32 %v3250_v12, %v2438_v14  ;;  %727 = vmatpush.bf16.msrb.mxu3 %v2437_v13  ;;  %v2548_v13 = vld [vmem:[#allocation6 + $0x60] sm:$0xf]  ;;  %v3279_v14 = vld [vmem:[#allocation6 + $0x64] sm:$0xf0] }
  0x6e   :  { %752 = vmatpush.bf16.msra.mxu1 %v2465_v43  ;;  %738 = vmatpush.bf16.msra.mxu0 %v2401_v61  ;;  %v2617_v43 = vor.u32 %v3294_v36, %v2614_v37  ;;  %v2532_v37 = vld [vmem:[#allocation6 + $0x40] sm:$0xf] }
  0x6f   :  { %v2533_v40 = vor.u32 %v3275_v38, %v2532_v37 }
  0x72   :  { %753 = vmatpush.bf16.msra.mxu1 %v2457_v55  ;;  %739 = vmatpush.bf16.msra.mxu0 %v2393_v9  ;;  %v3292_v9 = vld [vmem:[#allocation6 + $0xd4] sm:$0xf] }
  0x73   :  { %v2609_v12 = vor.u32 %v3292_v9, %v2606_v11  ;;  %v2508_v9 = vld [vmem:[#allocation6 + $0x10] sm:$0xf]  ;;  %v3268_v11 = vld [vmem:[#allocation6 + $0x14] sm:$0xf] }
  0x76   :  { %754 = vmatpush.bf16.msra.mxu1 %v2449_v3 }
  0x7a   :  { %755 = vmatpush.bf16.msra.mxu1 %v2441_v15  ;;  %v3278_v15 = vld [vmem:[#allocation6 + $0x64] sm:$0xf] }
  0xba   :  { %v223_v16 = vpop.f32.mrf.mxu0  ;;  %v237_v17 = vpop.f32.mrf.mxu1 }
  0xbb   :  { %v224_v20 = vadd.f32 %v223_v16, %v194_v18  ;;  %v238_v21 = vadd.f32 %v237_v17, %v195_v19  ;;  %v2380_v16 = vld [vmem:[#allocation4 + $0x10] sm:$0xf]  ;;  %v3237_v17 = vld [vmem:[#allocation4 + $0x14] sm:$0xf0] }
  0xbd   :  { %v242_v26 = vmax.f32 %v224_v20, 0.0  ;;  %v243_v27 = vmax.f32 %v238_v21, 0.0  ;;  %v2382_v20 = vld [vmem:[#allocation4 + $0x18] sm:$0xf0] }
  0xc2   :  { %v225_v22 = vpop.f32.mrf.mxu0  ;;  %v239_v23 = vpop.f32.mrf.mxu1 }
  0xc3   :  { %v226_v24 = vadd.f32 %v225_v22, %v194_v18  ;;  %v240_v25 = vadd.f32 %v239_v23, %v195_v19  ;;  %v3236_v18 = vld [vmem:[#allocation4 + $0x14] sm:$0xf]  ;;  %v2381_v19 = vor.u32 %v3237_v17, %v2380_v16  ;;  %v2372_v22 = vld [vmem:[#allocation4] sm:$0xf]  ;;  %v3235_v23 = vld [vmem:[#allocation4 + $0x4] sm:$0xf0]  ;;  %v2549_v16 = vor.u32 %v3279_v14, %v2548_v13 }
  0xc4   :  { %v2385_v21 = vor.u32 %v3236_v18, %v2382_v20  ;;  %v2550_v17 = vld [vmem:[#allocation6 + $0x68] sm:$0xf0]  ;;  %v2596_v18 = vld [vmem:[#allocation6 + $0xc0] sm:$0xf]  ;;  %v2510_v13 = vld [vmem:[#allocation6 + $0x18] sm:$0xf0] }
  0xc5   :  { %v244_v28 = vmax.f32 %v226_v24, 0.0  ;;  %v245_v29 = vmax.f32 %v240_v25, 0.0  ;;  %712 = vmatpush.bf16.msrb.mxu2 %v2381_v19  ;;  %v3234_v24 = vld [vmem:[#allocation4 + $0x4] sm:$0xf]  ;;  %v2373_v25 = vor.u32 %v3235_v23, %v2372_v22  ;;  %v3291_v19 = vld [vmem:[#allocation6 + $0xc4] sm:$0xf0]  ;;  %v2553_v20 = vor.u32 %v3278_v15, %v2550_v17 }
  0xc6   :  { %740 = vmatpush.bf16.msra.mxu0 %v2385_v21  ;;  %v2597_v21 = vor.u32 %v3291_v19, %v2596_v18  ;;  %v3290_v22 = vld [vmem:[#allocation6 + $0xc4] sm:$0xf]  ;;  %v2598_v23 = vld [vmem:[#allocation6 + $0xc8] sm:$0xf0]  ;;  %v2513_v14 = vor.u32 %v3268_v11, %v2510_v13  ;;  %v2500_v15 = vld [vmem:[#allocation6] sm:$0xf] }
  0xc7   :  { %v279_v30 = vpack.c.bf16 %v244_v28, %v242_v26  ;;  %v280_v31 = vpack.c.bf16 %v245_v29, %v243_v27  ;;  %v2374_v26 = vld [vmem:[#allocation4 + $0x8] sm:$0xf0]  ;;  %v2620_v28 = vld [vmem:[#allocation6 + $0xf0] sm:$0xf]  ;;  %v3297_v29 = vld [vmem:[#allocation6 + $0xf4] sm:$0xf0] }
  0xc8   :  { %v2377_v27 = vor.u32 %v3234_v24, %v2374_v26  ;;  %v2601_v24 = vor.u32 %v3290_v22, %v2598_v23  ;;  %v3277_v26 = vld [vmem:[#allocation6 + $0x54] sm:$0xf0]  ;;  %v3266_v17 = vld [vmem:[#allocation6 + $0x4] sm:$0xf]  ;;  %v2502_v19 = vld [vmem:[#allocation6 + $0x8] sm:$0xf0] }
  0xc9   :  { %454 = vmatmul.bf16.vlgmr.msra.gmra.mxu2 %v279_v30  ;;  %468 = vmatmul.bf16.vlgmr.msra.gmra.mxu3 %v280_v31  ;;  %v3329_v22 = vld [vmem:[#allocation7 + $0xf4] sm:$0xf0]  ;;  %v3328_v23 = vld [vmem:[#allocation7 + $0xf4] sm:$0xf]  ;;  %v2724_v11 = vld [vmem:[#allocation7 + $0xc0] sm:$0xf] }
  0xca   :  { %482 = vmatmul.bf16.vlgmr.msrb.gmra.mxu0 %v279_v30  ;;  %496 = vmatmul.bf16.vlgmr.msrb.gmra.mxu1 %v280_v31  ;;  %v3296_v30 = vld [vmem:[#allocation6 + $0xf4] sm:$0xf]  ;;  %v2621_v31 = vor.u32 %v3297_v29, %v2620_v28  ;;  %v2542_v29 = vld [vmem:[#allocation6 + $0x58] sm:$0xf0] }
  0xcb   :  { %713 = vmatpush.bf16.msrb.mxu2 %v2373_v25  ;;  %741 = vmatpush.bf16.msra.mxu0 %v2377_v27  ;;  %v2625_v35 = vor.u32 %v3296_v30, %v2622_v32  ;;  %v2540_v25 = vld [vmem:[#allocation6 + $0x50] sm:$0xf]  ;;  %v3276_v27 = vld [vmem:[#allocation6 + $0x54] sm:$0xf]  ;;  %v3289_v32 = vld [vmem:[#allocation6 + $0xb4] sm:$0xf0] }
  0xcc   :  { %980 = vmatpush.bf16.msra.mxu3 %v2621_v31  ;;  %v2541_v28 = vor.u32 %v3277_v26, %v2540_v25  ;;  %v2545_v30 = vor.u32 %v3276_v27, %v2542_v29  ;;  %v2588_v31 = vld [vmem:[#allocation6 + $0xb0] sm:$0xf]  ;;  %v2750_v25 = vld [vmem:[#allocation7 + $0xf8] sm:$0xf0]  ;;  %v2740_v26 = vld [vmem:[#allocation7 + $0xe0] sm:$0xf] }
  0xcd   :  { %1008 = vmatpush.bf16.msrb.mxu1 %v2625_v35  ;;  %v2589_v33 = vor.u32 %v3289_v32, %v2588_v31  ;;  %v2590_v35 = vld [vmem:[#allocation6 + $0xb8] sm:$0xf0]  ;;  %v3327_v27 = vld [vmem:[#allocation7 + $0xe4] sm:$0xf0]  ;;  %v3326_v29 = vld [vmem:[#allocation7 + $0xe4] sm:$0xf] }
  0xce   :  { %v2593_v36 = vor.u32 %v3288_v34, %v2590_v35  ;;  %v2684_v31 = vld [vmem:[#allocation7 + $0x70] sm:$0xf]  ;;  %v2741_v32 = vor.u32 %v3327_v27, %v2740_v26  ;;  %v3312_v34 = vld [vmem:[#allocation7 + $0x74] sm:$0xf]  ;;  %v2686_v35 = vld [vmem:[#allocation7 + $0x78] sm:$0xf0] }
  0xcf   :  { %966 = vmatpush.bf16.msra.mxu2 %v2557_v44  ;;  %994 = vmatpush.bf16.msrb.mxu0 %v2561_v45  ;;  %v3287_v44 = vld [vmem:[#allocation6 + $0xa4] sm:$0xf0]  ;;  %v3286_v45 = vld [vmem:[#allocation6 + $0xa4] sm:$0xf]  ;;  %v2689_v38 = vor.u32 %v3312_v34, %v2686_v35  ;;  %v3320_v27 = vld [vmem:[#allocation7 + $0xb4] sm:$0xf] }
  0xd0   :  { %981 = vmatpush.bf16.msra.mxu3 %v2613_v39  ;;  %v3274_v39 = vld [vmem:[#allocation6 + $0x44] sm:$0xf]  ;;  %v2662_v34 = vld [vmem:[#allocation7 + $0x48] sm:$0xf0] }
  0xd1   :  { %1009 = vmatpush.bf16.msrb.mxu1 %v2617_v43  ;;  %v2537_v42 = vor.u32 %v3274_v39, %v2534_v41  ;;  %v2580_v43 = vld [vmem:[#allocation6 + $0xa0] sm:$0xf]  ;;  %v538_v39 = vld [vmem:[%s3866_s6] sm:$0x3] }
  0xd2   :  { %v2581_v46 = vor.u32 %v3287_v44, %v2580_v43 }
  0xd3   :  { %967 = vmatpush.bf16.msra.mxu2 %v2549_v16  ;;  %995 = vmatpush.bf16.msrb.mxu0 %v2553_v20  ;;  %v3267_v16 = vld [vmem:[#allocation6 + $0x4] sm:$0xf0]  ;;  %v2505_v20 = vor.u32 %v3266_v17, %v2502_v19  ;;  %v3309_v19 = vld [vmem:[#allocation7 + $0x54] sm:$0xf0] }
  0xd4   :  { %982 = vmatpush.bf16.msra.mxu3 %v2605_v10  ;;  %v3269_v10 = vld [vmem:[#allocation6 + $0x14] sm:$0xf0]  ;;  %v2501_v18 = vor.u32 %v3267_v16, %v2500_v15  ;;  %v3322_v15 = vld [vmem:[#allocation7 + $0xc4] sm:$0xf]  ;;  %v2726_v16 = vld [vmem:[#allocation7 + $0xc8] sm:$0xf0] }
  0xd5   :  { %1010 = vmatpush.bf16.msrb.mxu1 %v2609_v12  ;;  %v2509_v12 = vor.u32 %v3269_v10, %v2508_v9  ;;  %v2678_v10 = vld [vmem:[#allocation7 + $0x68] sm:$0xf0]  ;;  %v2729_v17 = vor.u32 %v3322_v15, %v2726_v16  ;;  %v3361_v15 = vld [vmem:[#allocation9 + $0xf4] sm:$0xf0]  ;;  %v3360_v16 = vld [vmem:[#allocation9 + $0xf4] sm:$0xf] }
  0xd7   :  { %968 = vmatpush.bf16.msra.mxu2 %v2541_v28  ;;  %996 = vmatpush.bf16.msrb.mxu0 %v2545_v30  ;;  %v2753_v28 = vor.u32 %v3328_v23, %v2750_v25  ;;  %v2742_v30 = vld [vmem:[#allocation7 + $0xe8] sm:$0xf0]  ;;  %v3321_v25 = vld [vmem:[#allocation7 + $0xb4] sm:$0xf0] }
  0xd8   :  { %983 = vmatpush.bf16.msra.mxu3 %v2597_v21  ;;  %v2748_v21 = vld [vmem:[#allocation7 + $0xf0] sm:$0xf] }
  0xd9   :  { %1011 = vmatpush.bf16.msrb.mxu1 %v2601_v24  ;;  %v2749_v24 = vor.u32 %v3329_v22, %v2748_v21  ;;  %v2670_v22 = vld [vmem:[#allocation7 + $0x58] sm:$0xf0] }
  0xdb   :  { %969 = vmatpush.bf16.msra.mxu2 %v2533_v40  ;;  %997 = vmatpush.bf16.msrb.mxu0 %v2537_v42  ;;  %v543_v42 = vperm.slane %v538_v39, 1 }
  0xdc   :  { %984 = vmatpush.bf16.msra.mxu3 %v2589_v33  ;;  %v3313_v33 = vld [vmem:[#allocation7 + $0x74] sm:$0xf0] }
  0xdd   :  { %1012 = vmatpush.bf16.msrb.mxu1 %v2593_v36  ;;  %v2745_v36 = vor.u32 %v3326_v29, %v2742_v30  ;;  %v2685_v37 = vor.u32 %v3313_v33, %v2684_v31  ;;  %v2660_v30 = vld [vmem:[#allocation7 + $0x40] sm:$0xf]  ;;  %v3307_v31 = vld [vmem:[#allocation7 + $0x44] sm:$0xf0] }
  0xde   :  { %v2661_v33 = vor.u32 %v3307_v31, %v2660_v30 }
  0xe0   :  { %985 = vmatpush.bf16.msra.mxu3 %v2581_v46  ;;  %v542_v46 = vperm.slane %v538_v39, 0 }
 0x147   :  { %v483_v47 = vpop.f32.mrf.mxu0  ;;  %v497_v48 = vpop.f32.mrf.mxu1 }
 0x148   :  { %v484_v50 = vadd.f32 %v483_v47, %v283_v49  ;;  %v2582_v47 = vld [vmem:[#allocation6 + $0xa8] sm:$0xf0] }
 0x14a   :  { %v498_v55 = vadd.f32 %v497_v48, %v484_v50  ;;  %v2585_v48 = vor.u32 %v3286_v45, %v2582_v47  ;;  %v3273_v50 = vld [vmem:[#allocation6 + $0x34] sm:$0xf0] }
 0x14c   :  { %v455_v51 = vpop.f32.mrf.mxu2  ;;  %v469_v52 = vpop.f32.mrf.mxu3  ;;  %v503_v60 = vmax.f32 %v498_v55, 0.0  ;;  %1013 = vmatpush.bf16.msrb.mxu1 %v2585_v48  ;;  %v2572_v55 = vld [vmem:[#allocation6 + $0x90] sm:$0xf] }
 0x14d   :  { %v456_v57 = vadd.f32 %v455_v51, %v282_v53  ;;  %v3272_v51 = vld [vmem:[#allocation6 + $0x34] sm:$0xf] }
 0x14f   :  { %v485_v54 = vpop.f32.mrf.mxu0  ;;  %v499_v58 = vpop.f32.mrf.mxu1  ;;  %v470_v63 = vadd.f32 %v469_v52, %v456_v57  ;;  %v3284_v57 = vld [vmem:[#allocation6 + $0x94] sm:$0xf] }
 0x150   :  { %v486_v56 = vadd.f32 %v485_v54, %v283_v49  ;;  %v2524_v49 = vld [vmem:[#allocation6 + $0x30] sm:$0xf] }
 0x151   :  { %v502_v4 = vmax.f32 %v470_v63, 0.0  ;;  %v2525_v52 = vor.u32 %v3273_v50, %v2524_v49  ;;  %v3270_v63 = vld [vmem:[#allocation6 + $0x24] sm:$0xf] }
 0x152   :  { %v500_v59 = vadd.f32 %v499_v58, %v486_v56  ;;  %v3285_v56 = vld [vmem:[#allocation6 + $0x94] sm:$0xf0] }
 0x153   :  { %970 = vmatpush.bf16.msra.mxu2 %v2525_v52  ;;  %v2573_v58 = vor.u32 %v3285_v56, %v2572_v55 }
 0x154   :  { %v505_v61 = vmax.f32 %v500_v59, 0.0  ;;  %v457_v62 = vpop.f32.mrf.mxu2  ;;  %v471_v2 = vpop.f32.mrf.mxu3  ;;  %v2574_v59 = vld [vmem:[#allocation6 + $0x98] sm:$0xf0] }
 0x155   :  { %v458_v0 = vadd.f32 %v457_v62, %v282_v53  ;;  %v2526_v53 = vld [vmem:[#allocation6 + $0x38] sm:$0xf0]  ;;  %v3271_v62 = vld [vmem:[#allocation6 + $0x24] sm:$0xf0]  ;;  %986 = vmatpush.bf16.msra.mxu3 %v2573_v58 }
 0x156   :  { %v540_v1 = vpack.c.bf16 %v505_v61, %v503_v60  ;;  %v2529_v54 = vor.u32 %v3272_v51, %v2526_v53  ;;  %v2577_v60 = vor.u32 %v3284_v57, %v2574_v59  ;;  %v2516_v61 = vld [vmem:[#allocation6 + $0x20] sm:$0xf] }
 0x157   :  { %v472_v3 = vadd.f32 %v471_v2, %v458_v0  ;;  %v2517_v0 = vor.u32 %v3271_v62, %v2516_v61 }
 0x158   :  { %728 = vmatmul.bf16.vlgmr.msrb.gmra.mxu3 %v540_v1  ;;  %756 = vmatmul.bf16.vlgmr.msra.gmra.mxu1 %v540_v1  ;;  %v2518_v1 = vld [vmem:[#allocation6 + $0x28] sm:$0xf0] }
 0x159   :  { %v504_v5 = vmax.f32 %v472_v3, 0.0  ;;  %998 = vmatpush.bf16.msrb.mxu0 %v2529_v54  ;;  %1014 = vmatpush.bf16.msrb.mxu1 %v2577_v60  ;;  %v2521_v2 = vor.u32 %v3270_v63, %v2518_v1  ;;  %v2564_v3 = vld [vmem:[#allocation6 + $0x80] sm:$0xf]  ;;  %v3325_v1 = vld [vmem:[#allocation7 + $0xd4] sm:$0xf0] }
 0x15a   :  { %971 = vmatpush.bf16.msra.mxu2 %v2517_v0  ;;  %v2732_v0 = vld [vmem:[#allocation7 + $0xd0] sm:$0xf] }
 0x15b   :  { %v539_v6 = vpack.c.bf16 %v504_v5, %v502_v4  ;;  %v3283_v4 = vld [vmem:[#allocation6 + $0x84] sm:$0xf0]  ;;  %v3282_v5 = vld [vmem:[#allocation6 + $0x84] sm:$0xf] }
 0x15c   :  { %v2569_v8 = vor.u32 %v3282_v5, %v2566_v7  ;;  %v3311_v7 = vld [vmem:[#allocation7 + $0x64] sm:$0xf0] }
 0x15d   :  { %714 = vmatmul.bf16.vlgmr.msrb.gmra.mxu2 %v539_v6  ;;  %742 = vmatmul.bf16.vlgmr.msra.gmra.mxu0 %v539_v6  ;;  %v2565_v6 = vor.u32 %v3283_v4, %v2564_v3  ;;  %v2733_v3 = vor.u32 %v3325_v1, %v2732_v0  ;;  %v2734_v4 = vld [vmem:[#allocation7 + $0xd8] sm:$0xf0]  ;;  %v2694_v0 = vld [vmem:[#allocation7 + $0x88] sm:$0xf0] }
 0x15e   :  { %999 = vmatpush.bf16.msrb.mxu0 %v2521_v2  ;;  %1015 = vmatpush.bf16.msrb.mxu1 %v2569_v8  ;;  %v3324_v2 = vld [vmem:[#allocation7 + $0xd4] sm:$0xf]  ;;  %v3310_v8 = vld [vmem:[#allocation7 + $0x64] sm:$0xf] }
 0x15f   :  { %987 = vmatpush.bf16.msra.mxu3 %v2565_v6  ;;  %972 = vmatpush.bf16.msra.mxu2 %v2509_v12  ;;  %v2737_v5 = vor.u32 %v3324_v2, %v2734_v4  ;;  %v2676_v6 = vld [vmem:[#allocation7 + $0x60] sm:$0xf]  ;;  %v3323_v12 = vld [vmem:[#allocation7 + $0xc4] sm:$0xf0]  ;;  %v2681_v13 = vor.u32 %v3310_v8, %v2678_v10  ;;  %v2636_v2 = vld [vmem:[#allocation7 + $0x10] sm:$0xf] }
 0x160   :  { %v2677_v9 = vor.u32 %v3311_v7, %v2676_v6  ;;  %v3300_v4 = vld [vmem:[#allocation7 + $0x14] sm:$0xf]  ;;  %v2638_v6 = vld [vmem:[#allocation7 + $0x18] sm:$0xf0]  ;;  %v2628_v8 = vld [vmem:[#allocation7] sm:$0xf] }
 0x161   :  { %v2641_v7 = vor.u32 %v3300_v4, %v2638_v6  ;;  %v3298_v10 = vld [vmem:[#allocation7 + $0x4] sm:$0xf]  ;;  %v2852_v4 = vld [vmem:[#allocation9 + $0xc0] sm:$0xf] }
 0x162   :  { %1000 = vmatpush.bf16.msrb.mxu0 %v2513_v14  ;;  %1268 = vmatpush.bf16.msra.mxu1 %v2753_v28  ;;  %v2725_v14 = vor.u32 %v3323_v12, %v2724_v11  ;;  %v2718_v28 = vld [vmem:[#allocation7 + $0xb8] sm:$0xf0]  ;;  %v2630_v12 = vld [vmem:[#allocation7 + $0x8] sm:$0xf0] }
 0x163   :  { %973 = vmatpush.bf16.msra.mxu2 %v2501_v18  ;;  %1240 = vmatpush.bf16.msrb.mxu3 %v2749_v24  ;;  %v2668_v18 = vld [vmem:[#allocation7 + $0x50] sm:$0xf]  ;;  %v2721_v29 = vor.u32 %v3320_v27, %v2718_v28  ;;  %v3344_v27 = vld [vmem:[#allocation9 + $0x74] sm:$0xf]  ;;  %v2814_v28 = vld [vmem:[#allocation9 + $0x78] sm:$0xf0] }
 0x164   :  { %v2669_v21 = vor.u32 %v3309_v19, %v2668_v18  ;;  %v2716_v24 = vld [vmem:[#allocation7 + $0xb0] sm:$0xf]  ;;  %v2878_v18 = vld [vmem:[#allocation9 + $0xf8] sm:$0xf0]  ;;  %v2868_v19 = vld [vmem:[#allocation9 + $0xe0] sm:$0xf]  ;;  %v2817_v31 = vor.u32 %v3344_v27, %v2814_v28 }
 0x165   :  { %v2717_v26 = vor.u32 %v3321_v25, %v2716_v24  ;;  %v2812_v24 = vld [vmem:[#allocation9 + $0x70] sm:$0xf]  ;;  %v2790_v27 = vld [vmem:[#allocation9 + $0x48] sm:$0xf0] }
 0x166   :  { %1001 = vmatpush.bf16.msrb.mxu0 %v2505_v20  ;;  %1269 = vmatpush.bf16.msra.mxu1 %v2745_v36  ;;  %v3308_v20 = vld [vmem:[#allocation7 + $0x54] sm:$0xf]  ;;  %v2708_v36 = vld [vmem:[#allocation7 + $0xa0] sm:$0xf] }
 0x167   :  { %1226 = vmatpush.bf16.msrb.mxu2 %v2685_v37  ;;  %1241 = vmatpush.bf16.msrb.mxu3 %v2741_v32  ;;  %v2673_v23 = vor.u32 %v3308_v20, %v2670_v22  ;;  %v3306_v32 = vld [vmem:[#allocation7 + $0x44] sm:$0xf]  ;;  %v3319_v37 = vld [vmem:[#allocation7 + $0xa4] sm:$0xf0] }
 0x168   :  { %v2665_v35 = vor.u32 %v3306_v32, %v2662_v34  ;;  %v2709_v39 = vor.u32 %v3319_v37, %v2708_v36  ;;  %v3359_v20 = vld [vmem:[#allocation9 + $0xe4] sm:$0xf0]  ;;  %v3358_v22 = vld [vmem:[#allocation9 + $0xe4] sm:$0xf]  ;;  %v798_v32 = vld [vmem:[%s3868_s8] sm:$0x3] }
 0x169   :  { %v2869_v25 = vor.u32 %v3359_v20, %v2868_v19  ;;  %v3352_v20 = vld [vmem:[#allocation9 + $0xb4] sm:$0xf] }
 0x16a   :  { %1254 = vmatpush.bf16.msra.mxu0 %v2689_v38  ;;  %1270 = vmatpush.bf16.msra.mxu1 %v2737_v5  ;;  %v3318_v38 = vld [vmem:[#allocation7 + $0xa4] sm:$0xf] }
 0x16b   :  { %1242 = vmatpush.bf16.msrb.mxu3 %v2733_v3  ;;  %1227 = vmatpush.bf16.msrb.mxu2 %v2677_v9  ;;  %v3301_v3 = vld [vmem:[#allocation7 + $0x14] sm:$0xf0]  ;;  %v3299_v9 = vld [vmem:[#allocation7 + $0x4] sm:$0xf0] }
 0x16c   :  { %v2637_v5 = vor.u32 %v3301_v3, %v2636_v2  ;;  %v2629_v11 = vor.u32 %v3299_v9, %v2628_v8  ;;  %v2806_v3 = vld [vmem:[#allocation9 + $0x68] sm:$0xf0]  ;;  %v3354_v8 = vld [vmem:[#allocation9 + $0xc4] sm:$0xf] }
 0x16d   :  { %v2854_v9 = vld [vmem:[#allocation9 + $0xc8] sm:$0xf0] }
 0x16e   :  { %1255 = vmatpush.bf16.msra.mxu0 %v2681_v13  ;;  %1271 = vmatpush.bf16.msra.mxu1 %v2729_v17  ;;  %v2633_v13 = vor.u32 %v3298_v10, %v2630_v12  ;;  %v2857_v10 = vor.u32 %v3354_v8, %v2854_v9  ;;  %v3341_v12 = vld [vmem:[#allocation9 + $0x54] sm:$0xf0]  ;;  %v3392_v9 = vld [vmem:[#allocation10 + $0xf4] sm:$0xf] }
 0x16f   :  { %1243 = vmatpush.bf16.msrb.mxu3 %v2725_v14  ;;  %1228 = vmatpush.bf16.msrb.mxu2 %v2669_v21  ;;  %v2876_v14 = vld [vmem:[#allocation9 + $0xf0] sm:$0xf]  ;;  %v2881_v21 = vor.u32 %v3360_v16, %v2878_v18  ;;  %v3353_v18 = vld [vmem:[#allocation9 + $0xb4] sm:$0xf0] }
 0x170   :  { %v2877_v17 = vor.u32 %v3361_v15, %v2876_v14  ;;  %v2798_v15 = vld [vmem:[#allocation9 + $0x58] sm:$0xf0]  ;;  %v3393_v8 = vld [vmem:[#allocation10 + $0xf4] sm:$0xf0] }
 0x172   :  { %1256 = vmatpush.bf16.msra.mxu0 %v2673_v23  ;;  %1272 = vmatpush.bf16.msra.mxu1 %v2721_v29  ;;  %v2870_v23 = vld [vmem:[#allocation9 + $0xe8] sm:$0xf0] }
 0x173   :  { %1244 = vmatpush.bf16.msrb.mxu3 %v2717_v26  ;;  %1229 = vmatpush.bf16.msrb.mxu2 %v2661_v33  ;;  %v3345_v26 = vld [vmem:[#allocation9 + $0x74] sm:$0xf0]  ;;  %v2873_v29 = vor.u32 %v3358_v22, %v2870_v23  ;;  %v2788_v23 = vld [vmem:[#allocation9 + $0x40] sm:$0xf] }
 0x174   :  { %v2813_v30 = vor.u32 %v3345_v26, %v2812_v24  ;;  %v3339_v24 = vld [vmem:[#allocation9 + $0x44] sm:$0xf0] }
 0x175   :  { %v2789_v26 = vor.u32 %v3339_v24, %v2788_v23 }
 0x176   :  { %1257 = vmatpush.bf16.msra.mxu0 %v2665_v35  ;;  %v803_v35 = vperm.slane %v798_v32, 1 }
 0x177   :  { %1245 = vmatpush.bf16.msrb.mxu3 %v2709_v39  ;;  %v802_v39 = vperm.slane %v798_v32, 0 }
 0x1d5   :  { %v757_v40 = vpop.f32.mrf.mxu1 }
 0x1da   :  { %v743_v41 = vpop.f32.mrf.mxu0 }
 0x1db   :  { %v744_v43 = vadd.f32 %v743_v41, %v543_v42  ;;  %v729_v44 = vpop.f32.mrf.mxu3 }
 0x1dd   :  { %v758_v48 = vadd.f32 %v757_v40, %v744_v43  ;;  %v759_v50 = vpop.f32.mrf.mxu1  ;;  %v2710_v40 = vld [vmem:[#allocation7 + $0xa8] sm:$0xf0]  ;;  %v3305_v43 = vld [vmem:[#allocation7 + $0x34] sm:$0xf0] }
 0x1de   :  { %v2713_v41 = vor.u32 %v3318_v38, %v2710_v40 }
 0x1df   :  { %v763_v53 = vmax.f32 %v758_v48, 0.0  ;;  %v2700_v48 = vld [vmem:[#allocation7 + $0x90] sm:$0xf] }
 0x1e0   :  { %v715_v45 = vpop.f32.mrf.mxu2  ;;  %1273 = vmatpush.bf16.msra.mxu1 %v2713_v41 }
 0x1e1   :  { %v716_v51 = vadd.f32 %v715_v45, %v542_v46 }
 0x1e2   :  { %v745_v47 = vpop.f32.mrf.mxu0 }
 0x1e3   :  { %v746_v49 = vadd.f32 %v745_v47, %v543_v42  ;;  %v730_v56 = vadd.f32 %v729_v44, %v716_v51  ;;  %v731_v59 = vpop.f32.mrf.mxu3  ;;  %v2652_v42 = vld [vmem:[#allocation7 + $0x30] sm:$0xf]  ;;  %v3304_v44 = vld [vmem:[#allocation7 + $0x34] sm:$0xf] }
 0x1e4   :  { %v2653_v45 = vor.u32 %v3305_v43, %v2652_v42 }
 0x1e5   :  { %v760_v52 = vadd.f32 %v759_v50, %v746_v49  ;;  %v762_v61 = vmax.f32 %v730_v56, 0.0  ;;  %v3317_v49 = vld [vmem:[#allocation7 + $0x94] sm:$0xf0]  ;;  %v3316_v50 = vld [vmem:[#allocation7 + $0x94] sm:$0xf] }
 0x1e6   :  { %1230 = vmatpush.bf16.msrb.mxu2 %v2653_v45  ;;  %v2701_v51 = vor.u32 %v3317_v49, %v2700_v48  ;;  %v3302_v56 = vld [vmem:[#allocation7 + $0x24] sm:$0xf] }
 0x1e7   :  { %v765_v54 = vmax.f32 %v760_v52, 0.0  ;;  %v2702_v52 = vld [vmem:[#allocation7 + $0x98] sm:$0xf0] }
 0x1e8   :  { %v717_v55 = vpop.f32.mrf.mxu2  ;;  %1246 = vmatpush.bf16.msrb.mxu3 %v2701_v51 }
 0x1e9   :  { %v800_v57 = vpack.c.bf16 %v765_v54, %v763_v53  ;;  %v718_v58 = vadd.f32 %v717_v55, %v542_v46  ;;  %v2654_v46 = vld [vmem:[#allocation7 + $0x38] sm:$0xf0]  ;;  %v2705_v53 = vor.u32 %v3316_v50, %v2702_v52  ;;  %v2644_v54 = vld [vmem:[#allocation7 + $0x20] sm:$0xf]  ;;  %v3303_v55 = vld [vmem:[#allocation7 + $0x24] sm:$0xf0] }
 0x1ea   :  { %v2657_v47 = vor.u32 %v3304_v44, %v2654_v46 }
 0x1eb   :  { %v732_v60 = vadd.f32 %v731_v59, %v718_v58  ;;  %988 = vmatmul.bf16.vlgmr.msra.gmra.mxu3 %v800_v57  ;;  %1016 = vmatmul.bf16.vlgmr.msrb.gmra.mxu1 %v800_v57  ;;  %v2645_v57 = vor.u32 %v3303_v55, %v2644_v54  ;;  %v2646_v58 = vld [vmem:[#allocation7 + $0x28] sm:$0xf0] }
 0x1ec   :  { %1258 = vmatpush.bf16.msra.mxu0 %v2657_v47  ;;  %1274 = vmatpush.bf16.msra.mxu1 %v2705_v53  ;;  %v2649_v59 = vor.u32 %v3302_v56, %v2646_v58  ;;  %v3357_v58 = vld [vmem:[#allocation9 + $0xd4] sm:$0xf0] }
 0x1ed   :  { %v764_v62 = vmax.f32 %v732_v60, 0.0  ;;  %v2692_v60 = vld [vmem:[#allocation7 + $0x80] sm:$0xf]  ;;  %1231 = vmatpush.bf16.msrb.mxu2 %v2645_v57  ;;  %v2860_v57 = vld [vmem:[#allocation9 + $0xd0] sm:$0xf] }
 0x1ef   :  { %v799_v63 = vpack.c.bf16 %v764_v62, %v762_v61  ;;  %v3315_v61 = vld [vmem:[#allocation7 + $0x84] sm:$0xf0]  ;;  %v3314_v62 = vld [vmem:[#allocation7 + $0x84] sm:$0xf] }
 0x1f0   :  { %1259 = vmatpush.bf16.msra.mxu0 %v2649_v59  ;;  %v2697_v1 = vor.u32 %v3314_v62, %v2694_v0  ;;  %v3356_v59 = vld [vmem:[#allocation9 + $0xd4] sm:$0xf]  ;;  %v3343_v0 = vld [vmem:[#allocation9 + $0x64] sm:$0xf0] }
 0x1f1   :  { %974 = vmatmul.bf16.vlgmr.msra.gmra.mxu2 %v799_v63  ;;  %1002 = vmatmul.bf16.vlgmr.msrb.gmra.mxu0 %v799_v63  ;;  %v2693_v63 = vor.u32 %v3315_v61, %v2692_v60  ;;  %v2861_v60 = vor.u32 %v3357_v58, %v2860_v57  ;;  %v2862_v61 = vld [vmem:[#allocation9 + $0xd8] sm:$0xf0]  ;;  %v2822_v57 = vld [vmem:[#allocation9 + $0x88] sm:$0xf0] }
 0x1f2   :  { %1275 = vmatpush.bf16.msra.mxu1 %v2697_v1  ;;  %1232 = vmatpush.bf16.msrb.mxu2 %v2637_v5  ;;  %v2865_v62 = vor.u32 %v3356_v59, %v2862_v61  ;;  %v3342_v1 = vld [vmem:[#allocation9 + $0x64] sm:$0xf]  ;;  %v3355_v5 = vld [vmem:[#allocation9 + $0xc4] sm:$0xf0]  ;;  %v2764_v59 = vld [vmem:[#allocation9 + $0x10] sm:$0xf] }
 0x1f3   :  { %1247 = vmatpush.bf16.msrb.mxu3 %v2693_v63  ;;  %v2804_v63 = vld [vmem:[#allocation9 + $0x60] sm:$0xf]  ;;  %v2809_v6 = vor.u32 %v3342_v1, %v2806_v3  ;;  %v3332_v61 = vld [vmem:[#allocation9 + $0x14] sm:$0xf]  ;;  %v3330_v3 = vld [vmem:[#allocation9 + $0x4] sm:$0xf] }
 0x1f4   :  { %1260 = vmatpush.bf16.msra.mxu0 %v2641_v7  ;;  %v2805_v2 = vor.u32 %v3343_v0, %v2804_v63  ;;  %v2853_v7 = vor.u32 %v3355_v5, %v2852_v4  ;;  %v2766_v63 = vld [vmem:[#allocation9 + $0x18] sm:$0xf0]  ;;  %v2756_v1 = vld [vmem:[#allocation9] sm:$0xf]  ;;  %v2758_v5 = vld [vmem:[#allocation9 + $0x8] sm:$0xf0] }
 0x1f5   :  { %v2769_v0 = vor.u32 %v3332_v61, %v2766_v63  ;;  %v2980_v61 = vld [vmem:[#allocation10 + $0xc0] sm:$0xf] }
 0x1f6   :  { %1233 = vmatpush.bf16.msrb.mxu2 %v2629_v11  ;;  %1528 = vmatpush.bf16.msrb.mxu1 %v2881_v21  ;;  %v2796_v11 = vld [vmem:[#allocation9 + $0x50] sm:$0xf]  ;;  %v2846_v21 = vld [vmem:[#allocation9 + $0xb8] sm:$0xf0] }
 0x1f7   :  { %1500 = vmatpush.bf16.msra.mxu3 %v2877_v17  ;;  %v2797_v14 = vor.u32 %v3341_v12, %v2796_v11  ;;  %v2844_v17 = vld [vmem:[#allocation9 + $0xb0] sm:$0xf]  ;;  %v2849_v22 = vor.u32 %v3352_v20, %v2846_v21  ;;  %v3006_v11 = vld [vmem:[#allocation10 + $0xf8] sm:$0xf0]  ;;  %v2996_v12 = vld [vmem:[#allocation10 + $0xe0] sm:$0xf] }
 0x1f8   :  { %1261 = vmatpush.bf16.msra.mxu0 %v2633_v13  ;;  %v3340_v13 = vld [vmem:[#allocation9 + $0x54] sm:$0xf]  ;;  %v2845_v19 = vor.u32 %v3353_v18, %v2844_v17  ;;  %v2940_v17 = vld [vmem:[#allocation10 + $0x70] sm:$0xf]  ;;  %v2942_v21 = vld [vmem:[#allocation10 + $0x78] sm:$0xf0] }
 0x1f9   :  { %v2801_v16 = vor.u32 %v3340_v13, %v2798_v15  ;;  %v3391_v13 = vld [vmem:[#allocation10 + $0xe4] sm:$0xf0]  ;;  %v3390_v15 = vld [vmem:[#allocation10 + $0xe4] sm:$0xf]  ;;  %v3376_v20 = vld [vmem:[#allocation10 + $0x74] sm:$0xf] }
 0x1fa   :  { %1486 = vmatpush.bf16.msra.mxu2 %v2813_v30  ;;  %1529 = vmatpush.bf16.msrb.mxu1 %v2873_v29  ;;  %v2836_v29 = vld [vmem:[#allocation9 + $0xa0] sm:$0xf]  ;;  %v3351_v30 = vld [vmem:[#allocation9 + $0xa4] sm:$0xf0]  ;;  %v2997_v18 = vor.u32 %v3391_v13, %v2996_v12  ;;  %v2945_v24 = vor.u32 %v3376_v20, %v2942_v21  ;;  %v3384_v13 = vld [vmem:[#allocation10 + $0xb4] sm:$0xf] }
 0x1fb   :  { %1501 = vmatpush.bf16.msra.mxu3 %v2869_v25  ;;  %v3338_v25 = vld [vmem:[#allocation9 + $0x44] sm:$0xf]  ;;  %v2837_v32 = vor.u32 %v3351_v30, %v2836_v29  ;;  %v2918_v20 = vld [vmem:[#allocation10 + $0x48] sm:$0xf0] }
 0x1fc   :  { %1514 = vmatpush.bf16.msrb.mxu0 %v2817_v31  ;;  %v2793_v28 = vor.u32 %v3338_v25, %v2790_v27  ;;  %v3350_v31 = vld [vmem:[#allocation9 + $0xa4] sm:$0xf]  ;;  %v1058_v25 = vld [vmem:[%s3870_s10] sm:$0x3] }
 0x1fe   :  { %1530 = vmatpush.bf16.msrb.mxu1 %v2865_v62  ;;  %1487 = vmatpush.bf16.msra.mxu2 %v2805_v2  ;;  %v3331_v2 = vld [vmem:[#allocation9 + $0x4] sm:$0xf0] }
 0x1ff   :  { %1502 = vmatpush.bf16.msra.mxu3 %v2861_v60  ;;  %v3333_v60 = vld [vmem:[#allocation9 + $0x14] sm:$0xf0]  ;;  %v2757_v4 = vor.u32 %v3331_v2, %v2756_v1  ;;  %v3386_v1 = vld [vmem:[#allocation10 + $0xc4] sm:$0xf]  ;;  %v2982_v2 = vld [vmem:[#allocation10 + $0xc8] sm:$0xf0] }
 0x200   :  { %1515 = vmatpush.bf16.msrb.mxu0 %v2809_v6  ;;  %v2765_v62 = vor.u32 %v3333_v60, %v2764_v59  ;;  %v2761_v6 = vor.u32 %v3330_v3, %v2758_v5  ;;  %v2934_v60 = vld [vmem:[#allocation10 + $0x68] sm:$0xf0]  ;;  %v2985_v3 = vor.u32 %v3386_v1, %v2982_v2  ;;  %v3373_v5 = vld [vmem:[#allocation10 + $0x54] sm:$0xf0]  ;;  %v3424_v2 = vld [vmem:[#allocation12 + $0xf4] sm:$0xf] }
 0x201   :  { %v3425_v1 = vld [vmem:[#allocation12 + $0xf4] sm:$0xf0] }
 0x202   :  { %1531 = vmatpush.bf16.msrb.mxu1 %v2857_v10  ;;  %1488 = vmatpush.bf16.msra.mxu2 %v2797_v14  ;;  %v3009_v14 = vor.u32 %v3392_v9, %v3006_v11  ;;  %v3385_v11 = vld [vmem:[#allocation10 + $0xb4] sm:$0xf0] }
 0x203   :  { %1503 = vmatpush.bf16.msra.mxu3 %v2853_v7  ;;  %v3004_v7 = vld [vmem:[#allocation10 + $0xf0] sm:$0xf] }
 0x204   :  { %1516 = vmatpush.bf16.msrb.mxu0 %v2801_v16  ;;  %v3005_v10 = vor.u32 %v3393_v8, %v3004_v7  ;;  %v2998_v16 = vld [vmem:[#allocation10 + $0xe8] sm:$0xf0]  ;;  %v2926_v8 = vld [vmem:[#allocation10 + $0x58] sm:$0xf0] }
 0x206   :  { %1532 = vmatpush.bf16.msrb.mxu1 %v2849_v22  ;;  %1489 = vmatpush.bf16.msra.mxu2 %v2789_v26  ;;  %v3001_v22 = vor.u32 %v3390_v15, %v2998_v16  ;;  %v2916_v16 = vld [vmem:[#allocation10 + $0x40] sm:$0xf] }
 0x207   :  { %1504 = vmatpush.bf16.msra.mxu3 %v2845_v19  ;;  %v3377_v19 = vld [vmem:[#allocation10 + $0x74] sm:$0xf0] }
 0x208   :  { %1517 = vmatpush.bf16.msrb.mxu0 %v2793_v28  ;;  %v2941_v23 = vor.u32 %v3377_v19, %v2940_v17  ;;  %v1063_v28 = vperm.slane %v1058_v25, 1  ;;  %v3371_v17 = vld [vmem:[#allocation10 + $0x44] sm:$0xf0] }
 0x209   :  { %v2917_v19 = vor.u32 %v3371_v17, %v2916_v16 }
 0x20b   :  { %1505 = vmatpush.bf16.msra.mxu3 %v2837_v32  ;;  %v1062_v32 = vperm.slane %v1058_v25, 0 }
 0x268   :  { %v1017_v33 = vpop.f32.mrf.mxu1 }
 0x26e   :  { %v1003_v34 = vpop.f32.mrf.mxu0  ;;  %v989_v37 = vpop.f32.mrf.mxu3 }
 0x26f   :  { %v1004_v36 = vadd.f32 %v1003_v34, %v803_v35 }
 0x270   :  { %v1019_v43 = vpop.f32.mrf.mxu1 }
 0x271   :  { %v1018_v41 = vadd.f32 %v1017_v33, %v1004_v36  ;;  %v2838_v33 = vld [vmem:[#allocation9 + $0xa8] sm:$0xf0]  ;;  %v3337_v36 = vld [vmem:[#allocation9 + $0x34] sm:$0xf0] }
 0x272   :  { %v2841_v34 = vor.u32 %v3350_v31, %v2838_v33 }
 0x273   :  { %v1023_v46 = vmax.f32 %v1018_v41, 0.0  ;;  %v2828_v41 = vld [vmem:[#allocation9 + $0x90] sm:$0xf] }
 0x274   :  { %v975_v38 = vpop.f32.mrf.mxu2  ;;  %1533 = vmatpush.bf16.msrb.mxu1 %v2841_v34 }
 0x275   :  { %v976_v44 = vadd.f32 %v975_v38, %v802_v39 }
 0x276   :  { %v1005_v40 = vpop.f32.mrf.mxu0  ;;  %v991_v52 = vpop.f32.mrf.mxu3 }
 0x277   :  { %v1006_v42 = vadd.f32 %v1005_v40, %v803_v35  ;;  %v990_v49 = vadd.f32 %v989_v37, %v976_v44  ;;  %v2780_v35 = vld [vmem:[#allocation9 + $0x30] sm:$0xf]  ;;  %v3336_v37 = vld [vmem:[#allocation9 + $0x34] sm:$0xf] }
 0x278   :  { %v2781_v38 = vor.u32 %v3337_v36, %v2780_v35 }
 0x279   :  { %v1020_v45 = vadd.f32 %v1019_v43, %v1006_v42  ;;  %v1022_v54 = vmax.f32 %v990_v49, 0.0  ;;  %v3349_v42 = vld [vmem:[#allocation9 + $0x94] sm:$0xf0]  ;;  %v3348_v43 = vld [vmem:[#allocation9 + $0x94] sm:$0xf] }
 0x27a   :  { %1490 = vmatpush.bf16.msra.mxu2 %v2781_v38  ;;  %v2829_v44 = vor.u32 %v3349_v42, %v2828_v41  ;;  %v3334_v49 = vld [vmem:[#allocation9 + $0x24] sm:$0xf] }
 0x27b   :  { %v1025_v47 = vmax.f32 %v1020_v45, 0.0  ;;  %v2830_v45 = vld [vmem:[#allocation9 + $0x98] sm:$0xf0] }
 0x27c   :  { %v977_v48 = vpop.f32.mrf.mxu2  ;;  %1506 = vmatpush.bf16.msra.mxu3 %v2829_v44 }
 0x27d   :  { %v1060_v50 = vpack.c.bf16 %v1025_v47, %v1023_v46  ;;  %v978_v51 = vadd.f32 %v977_v48, %v802_v39  ;;  %v2782_v39 = vld [vmem:[#allocation9 + $0x38] sm:$0xf0]  ;;  %v2833_v46 = vor.u32 %v3348_v43, %v2830_v45  ;;  %v2772_v47 = vld [vmem:[#allocation9 + $0x20] sm:$0xf]  ;;  %v3335_v48 = vld [vmem:[#allocation9 + $0x24] sm:$0xf0] }
 0x27e   :  { %v2785_v40 = vor.u32 %v3336_v37, %v2782_v39 }
 0x27f   :  { %v992_v53 = vadd.f32 %v991_v52, %v978_v51  ;;  %1248 = vmatmul.bf16.vlgmr.msrb.gmra.mxu3 %v1060_v50  ;;  %1276 = vmatmul.bf16.vlgmr.msra.gmra.mxu1 %v1060_v50  ;;  %v2773_v50 = vor.u32 %v3335_v48, %v2772_v47  ;;  %v2774_v51 = vld [vmem:[#allocation9 + $0x28] sm:$0xf0] }
 0x280   :  { %1518 = vmatpush.bf16.msrb.mxu0 %v2785_v40  ;;  %1534 = vmatpush.bf16.msrb.mxu1 %v2833_v46  ;;  %v2777_v52 = vor.u32 %v3334_v49, %v2774_v51  ;;  %v3389_v51 = vld [vmem:[#allocation10 + $0xd4] sm:$0xf0] }
 0x281   :  { %v1024_v55 = vmax.f32 %v992_v53, 0.0  ;;  %v2820_v53 = vld [vmem:[#allocation9 + $0x80] sm:$0xf]  ;;  %1491 = vmatpush.bf16.msra.mxu2 %v2773_v50  ;;  %v2988_v50 = vld [vmem:[#allocation10 + $0xd0] sm:$0xf] }
 0x283   :  { %v1059_v56 = vpack.c.bf16 %v1024_v55, %v1022_v54  ;;  %v3347_v54 = vld [vmem:[#allocation9 + $0x84] sm:$0xf0]  ;;  %v3346_v55 = vld [vmem:[#allocation9 + $0x84] sm:$0xf] }
 0x284   :  { %1519 = vmatpush.bf16.msrb.mxu0 %v2777_v52  ;;  %v2825_v58 = vor.u32 %v3346_v55, %v2822_v57  ;;  %v3388_v52 = vld [vmem:[#allocation10 + $0xd4] sm:$0xf]  ;;  %v3375_v57 = vld [vmem:[#allocation10 + $0x64] sm:$0xf0] }
 0x285   :  { %1234 = vmatmul.bf16.vlgmr.msrb.gmra.mxu2 %v1059_v56  ;;  %1262 = vmatmul.bf16.vlgmr.msra.gmra.mxu0 %v1059_v56  ;;  %v2821_v56 = vor.u32 %v3347_v54, %v2820_v53  ;;  %v2989_v53 = vor.u32 %v3389_v51, %v2988_v50  ;;  %v2990_v54 = vld [vmem:[#allocation10 + $0xd8] sm:$0xf0]  ;;  %v2950_v50 = vld [vmem:[#allocation10 + $0x88] sm:$0xf0] }
 0x286   :  { %1535 = vmatpush.bf16.msrb.mxu1 %v2825_v58  ;;  %1492 = vmatpush.bf16.msra.mxu2 %v2765_v62  ;;  %v2993_v55 = vor.u32 %v3388_v52, %v2990_v54  ;;  %v3374_v58 = vld [vmem:[#allocation10 + $0x64] sm:$0xf]  ;;  %v3387_v62 = vld [vmem:[#allocation10 + $0xc4] sm:$0xf0]  ;;  %v2892_v52 = vld [vmem:[#allocation10 + $0x10] sm:$0xf] }
 0x287   :  { %1507 = vmatpush.bf16.msra.mxu3 %v2821_v56  ;;  %v2932_v56 = vld [vmem:[#allocation10 + $0x60] sm:$0xf]  ;;  %v2937_v63 = vor.u32 %v3374_v58, %v2934_v60  ;;  %v3364_v54 = vld [vmem:[#allocation10 + $0x14] sm:$0xf]  ;;  %v3362_v60 = vld [vmem:[#allocation10 + $0x4] sm:$0xf] }
 0x288   :  { %1520 = vmatpush.bf16.msrb.mxu0 %v2769_v0  ;;  %v2933_v59 = vor.u32 %v3375_v57, %v2932_v56  ;;  %v2981_v0 = vor.u32 %v3387_v62, %v2980_v61  ;;  %v2894_v56 = vld [vmem:[#allocation10 + $0x18] sm:$0xf0]  ;;  %v2884_v58 = vld [vmem:[#allocation10] sm:$0xf]  ;;  %v2886_v62 = vld [vmem:[#allocation10 + $0x8] sm:$0xf0] }
 0x289   :  { %v2897_v57 = vor.u32 %v3364_v54, %v2894_v56  ;;  %v3108_v54 = vld [vmem:[#allocation12 + $0xc0] sm:$0xf] }
 0x28a   :  { %1493 = vmatpush.bf16.msra.mxu2 %v2757_v4  ;;  %1788 = vmatpush.bf16.msra.mxu1 %v3009_v14  ;;  %v2924_v4 = vld [vmem:[#allocation10 + $0x50] sm:$0xf]  ;;  %v2974_v14 = vld [vmem:[#allocation10 + $0xb8] sm:$0xf0] }
 0x28b   :  { %1760 = vmatpush.bf16.msrb.mxu3 %v3005_v10  ;;  %v2925_v7 = vor.u32 %v3373_v5, %v2924_v4  ;;  %v2972_v10 = vld [vmem:[#allocation10 + $0xb0] sm:$0xf]  ;;  %v2977_v15 = vor.u32 %v3384_v13, %v2974_v14  ;;  %v3134_v4 = vld [vmem:[#allocation12 + $0xf8] sm:$0xf0]  ;;  %v3124_v5 = vld [vmem:[#allocation12 + $0xe0] sm:$0xf] }
 0x28c   :  { %1521 = vmatpush.bf16.msrb.mxu0 %v2761_v6  ;;  %v3372_v6 = vld [vmem:[#allocation10 + $0x54] sm:$0xf]  ;;  %v2973_v12 = vor.u32 %v3385_v11, %v2972_v10  ;;  %v3068_v10 = vld [vmem:[#allocation12 + $0x70] sm:$0xf]  ;;  %v3070_v14 = vld [vmem:[#allocation12 + $0x78] sm:$0xf0] }
 0x28d   :  { %v2929_v9 = vor.u32 %v3372_v6, %v2926_v8  ;;  %v3423_v6 = vld [vmem:[#allocation12 + $0xe4] sm:$0xf0]  ;;  %v3422_v8 = vld [vmem:[#allocation12 + $0xe4] sm:$0xf]  ;;  %v3408_v13 = vld [vmem:[#allocation12 + $0x74] sm:$0xf] }
 0x28e   :  { %1746 = vmatpush.bf16.msrb.mxu2 %v2941_v23  ;;  %1789 = vmatpush.bf16.msra.mxu1 %v3001_v22  ;;  %v2964_v22 = vld [vmem:[#allocation10 + $0xa0] sm:$0xf]  ;;  %v3383_v23 = vld [vmem:[#allocation10 + $0xa4] sm:$0xf0]  ;;  %v3125_v11 = vor.u32 %v3423_v6, %v3124_v5  ;;  %v3073_v17 = vor.u32 %v3408_v13, %v3070_v14  ;;  %v3416_v6 = vld [vmem:[#allocation12 + $0xb4] sm:$0xf] }
 0x28f   :  { %1761 = vmatpush.bf16.msrb.mxu3 %v2997_v18  ;;  %v3370_v18 = vld [vmem:[#allocation10 + $0x44] sm:$0xf]  ;;  %v2965_v25 = vor.u32 %v3383_v23, %v2964_v22  ;;  %v3046_v13 = vld [vmem:[#allocation12 + $0x48] sm:$0xf0] }
 0x290   :  { %1774 = vmatpush.bf16.msra.mxu0 %v2945_v24  ;;  %v2921_v21 = vor.u32 %v3370_v18, %v2918_v20  ;;  %v3382_v24 = vld [vmem:[#allocation10 + $0xa4] sm:$0xf]  ;;  %v1318_v18 = vld [vmem:[%s3872_s12] sm:$0x3] }
 0x292   :  { %1790 = vmatpush.bf16.msra.mxu1 %v2993_v55  ;;  %1747 = vmatpush.bf16.msrb.mxu2 %v2933_v59  ;;  %v3363_v59 = vld [vmem:[#allocation10 + $0x4] sm:$0xf0] }
 0x293   :  { %1762 = vmatpush.bf16.msrb.mxu3 %v2989_v53  ;;  %v3365_v53 = vld [vmem:[#allocation10 + $0x14] sm:$0xf0]  ;;  %v2885_v61 = vor.u32 %v3363_v59, %v2884_v58  ;;  %v3418_v58 = vld [vmem:[#allocation12 + $0xc4] sm:$0xf]  ;;  %v3110_v59 = vld [vmem:[#allocation12 + $0xc8] sm:$0xf0] }
 0x294   :  { %1775 = vmatpush.bf16.msra.mxu0 %v2937_v63  ;;  %v2893_v55 = vor.u32 %v3365_v53, %v2892_v52  ;;  %v2889_v63 = vor.u32 %v3362_v60, %v2886_v62  ;;  %v3062_v53 = vld [vmem:[#allocation12 + $0x68] sm:$0xf0]  ;;  %v3113_v60 = vor.u32 %v3418_v58, %v3110_v59  ;;  %v3405_v62 = vld [vmem:[#allocation12 + $0x54] sm:$0xf0]  ;;  %v3440_v59 = vld [vmem:[#allocation13 + $0x70] sm:$0xff] }
 0x295   :  { %v3433_v58 = vld [vmem:[#allocation13 + $0x38] sm:$0xff] }
 0x296   :  { %1791 = vmatpush.bf16.msra.mxu1 %v2985_v3  ;;  %1748 = vmatpush.bf16.msrb.mxu2 %v2925_v7  ;;  %v3137_v7 = vor.u32 %v3424_v2, %v3134_v4  ;;  %v3417_v4 = vld [vmem:[#allocation12 + $0xb4] sm:$0xf0] }
 0x297   :  { %1763 = vmatpush.bf16.msrb.mxu3 %v2981_v0  ;;  %v3132_v0 = vld [vmem:[#allocation12 + $0xf0] sm:$0xf] }
 0x298   :  { %1776 = vmatpush.bf16.msra.mxu0 %v2929_v9  ;;  %v3133_v3 = vor.u32 %v3425_v1, %v3132_v0  ;;  %v3126_v9 = vld [vmem:[#allocation12 + $0xe8] sm:$0xf0]  ;;  %v3054_v1 = vld [vmem:[#allocation12 + $0x58] sm:$0xf0] }
 0x29a   :  { %1792 = vmatpush.bf16.msra.mxu1 %v2977_v15  ;;  %1749 = vmatpush.bf16.msrb.mxu2 %v2917_v19  ;;  %v3129_v15 = vor.u32 %v3422_v8, %v3126_v9  ;;  %v3044_v9 = vld [vmem:[#allocation12 + $0x40] sm:$0xf] }
 0x29b   :  { %1764 = vmatpush.bf16.msrb.mxu3 %v2973_v12  ;;  %v3409_v12 = vld [vmem:[#allocation12 + $0x74] sm:$0xf0] }
 0x29c   :  { %1777 = vmatpush.bf16.msra.mxu0 %v2921_v21  ;;  %v3069_v16 = vor.u32 %v3409_v12, %v3068_v10  ;;  %v1323_v21 = vperm.slane %v1318_v18, 1  ;;  %v3403_v10 = vld [vmem:[#allocation12 + $0x44] sm:$0xf0] }
 0x29d   :  { %v3045_v12 = vor.u32 %v3403_v10, %v3044_v9 }
 0x29f   :  { %1765 = vmatpush.bf16.msrb.mxu3 %v2965_v25  ;;  %v1322_v25 = vperm.slane %v1318_v18, 0 }
 0x2fc   :  { %v1277_v26 = vpop.f32.mrf.mxu1 }
 0x302   :  { %v1263_v27 = vpop.f32.mrf.mxu0  ;;  %v1249_v30 = vpop.f32.mrf.mxu3 }
 0x303   :  { %v1264_v29 = vadd.f32 %v1263_v27, %v1063_v28 }
 0x304   :  { %v1279_v36 = vpop.f32.mrf.mxu1 }
 0x305   :  { %v1278_v34 = vadd.f32 %v1277_v26, %v1264_v29  ;;  %v2966_v26 = vld [vmem:[#allocation10 + $0xa8] sm:$0xf0]  ;;  %v3369_v29 = vld [vmem:[#allocation10 + $0x34] sm:$0xf0] }
 0x306   :  { %v2969_v27 = vor.u32 %v3382_v24, %v2966_v26 }
 0x307   :  { %v1283_v39 = vmax.f32 %v1278_v34, 0.0  ;;  %v2956_v34 = vld [vmem:[#allocation10 + $0x90] sm:$0xf] }
 0x308   :  { %v1235_v31 = vpop.f32.mrf.mxu2  ;;  %1793 = vmatpush.bf16.msra.mxu1 %v2969_v27 }
 0x309   :  { %v1236_v37 = vadd.f32 %v1235_v31, %v1062_v32 }
 0x30a   :  { %v1265_v33 = vpop.f32.mrf.mxu0  ;;  %v1251_v45 = vpop.f32.mrf.mxu3 }
 0x30b   :  { %v1266_v35 = vadd.f32 %v1265_v33, %v1063_v28  ;;  %v1250_v42 = vadd.f32 %v1249_v30, %v1236_v37  ;;  %v2908_v28 = vld [vmem:[#allocation10 + $0x30] sm:$0xf]  ;;  %v3368_v30 = vld [vmem:[#allocation10 + $0x34] sm:$0xf] }
 0x30c   :  { %v2909_v31 = vor.u32 %v3369_v29, %v2908_v28 }
 0x30d   :  { %v1280_v38 = vadd.f32 %v1279_v36, %v1266_v35  ;;  %v1282_v47 = vmax.f32 %v1250_v42, 0.0  ;;  %v3381_v35 = vld [vmem:[#allocation10 + $0x94] sm:$0xf0]  ;;  %v3380_v36 = vld [vmem:[#allocation10 + $0x94] sm:$0xf] }
 0x30e   :  { %1750 = vmatpush.bf16.msrb.mxu2 %v2909_v31  ;;  %v2957_v37 = vor.u32 %v3381_v35, %v2956_v34  ;;  %v3366_v42 = vld [vmem:[#allocation10 + $0x24] sm:$0xf] }
 0x30f   :  { %v1285_v40 = vmax.f32 %v1280_v38, 0.0  ;;  %v2958_v38 = vld [vmem:[#allocation10 + $0x98] sm:$0xf0] }
 0x310   :  { %v1237_v41 = vpop.f32.mrf.mxu2  ;;  %1766 = vmatpush.bf16.msrb.mxu3 %v2957_v37 }
 0x311   :  { %v1320_v43 = vpack.c.bf16 %v1285_v40, %v1283_v39  ;;  %v1238_v44 = vadd.f32 %v1237_v41, %v1062_v32  ;;  %v2910_v32 = vld [vmem:[#allocation10 + $0x38] sm:$0xf0]  ;;  %v2961_v39 = vor.u32 %v3380_v36, %v2958_v38  ;;  %v2900_v40 = vld [vmem:[#allocation10 + $0x20] sm:$0xf]  ;;  %v3367_v41 = vld [vmem:[#allocation10 + $0x24] sm:$0xf0] }
 0x312   :  { %v2913_v33 = vor.u32 %v3368_v30, %v2910_v32 }
 0x313   :  { %v1252_v46 = vadd.f32 %v1251_v45, %v1238_v44  ;;  %1508 = vmatmul.bf16.vlgmr.msra.gmra.mxu3 %v1320_v43  ;;  %1536 = vmatmul.bf16.vlgmr.msrb.gmra.mxu1 %v1320_v43  ;;  %v2901_v43 = vor.u32 %v3367_v41, %v2900_v40  ;;  %v2902_v44 = vld [vmem:[#allocation10 + $0x28] sm:$0xf0] }
 0x314   :  { %1778 = vmatpush.bf16.msra.mxu0 %v2913_v33  ;;  %1794 = vmatpush.bf16.msra.mxu1 %v2961_v39  ;;  %v2905_v45 = vor.u32 %v3366_v42, %v2902_v44  ;;  %v3421_v44 = vld [vmem:[#allocation12 + $0xd4] sm:$0xf0] }
 0x315   :  { %v1284_v48 = vmax.f32 %v1252_v46, 0.0  ;;  %v2948_v46 = vld [vmem:[#allocation10 + $0x80] sm:$0xf]  ;;  %1751 = vmatpush.bf16.msrb.mxu2 %v2901_v43  ;;  %v3116_v43 = vld [vmem:[#allocation12 + $0xd0] sm:$0xf] }
 0x317   :  { %v1319_v49 = vpack.c.bf16 %v1284_v48, %v1282_v47  ;;  %v3379_v47 = vld [vmem:[#allocation10 + $0x84] sm:$0xf0]  ;;  %v3378_v48 = vld [vmem:[#allocation10 + $0x84] sm:$0xf] }
 0x318   :  { %1779 = vmatpush.bf16.msra.mxu0 %v2905_v45  ;;  %v2953_v51 = vor.u32 %v3378_v48, %v2950_v50  ;;  %v3420_v45 = vld [vmem:[#allocation12 + $0xd4] sm:$0xf]  ;;  %v3407_v50 = vld [vmem:[#allocation12 + $0x64] sm:$0xf0] }
 0x319   :  { %1494 = vmatmul.bf16.vlgmr.msra.gmra.mxu2 %v1319_v49  ;;  %1522 = vmatmul.bf16.vlgmr.msrb.gmra.mxu0 %v1319_v49  ;;  %v2949_v49 = vor.u32 %v3379_v47, %v2948_v46  ;;  %v3117_v46 = vor.u32 %v3421_v44, %v3116_v43  ;;  %v3118_v47 = vld [vmem:[#allocation12 + $0xd8] sm:$0xf0]  ;;  %v3078_v43 = vld [vmem:[#allocation12 + $0x88] sm:$0xf0] }
 0x31a   :  { %1795 = vmatpush.bf16.msra.mxu1 %v2953_v51  ;;  %1752 = vmatpush.bf16.msrb.mxu2 %v2893_v55  ;;  %v3121_v48 = vor.u32 %v3420_v45, %v3118_v47  ;;  %v3406_v51 = vld [vmem:[#allocation12 + $0x64] sm:$0xf]  ;;  %v3419_v55 = vld [vmem:[#allocation12 + $0xc4] sm:$0xf0]  ;;  %v3020_v45 = vld [vmem:[#allocation12 + $0x10] sm:$0xf] }
 0x31b   :  { %1767 = vmatpush.bf16.msrb.mxu3 %v2949_v49  ;;  %v3060_v49 = vld [vmem:[#allocation12 + $0x60] sm:$0xf]  ;;  %v3065_v56 = vor.u32 %v3406_v51, %v3062_v53  ;;  %v3396_v47 = vld [vmem:[#allocation12 + $0x14] sm:$0xf]  ;;  %v3394_v53 = vld [vmem:[#allocation12 + $0x4] sm:$0xf] }
 0x31c   :  { %1780 = vmatpush.bf16.msra.mxu0 %v2897_v57  ;;  %v3061_v52 = vor.u32 %v3407_v50, %v3060_v49  ;;  %v3109_v57 = vor.u32 %v3419_v55, %v3108_v54  ;;  %v3022_v49 = vld [vmem:[#allocation12 + $0x18] sm:$0xf0]  ;;  %v3012_v51 = vld [vmem:[#allocation12] sm:$0xf]  ;;  %v3014_v55 = vld [vmem:[#allocation12 + $0x8] sm:$0xf0] }
 0x31d   :  { %v3025_v50 = vor.u32 %v3396_v47, %v3022_v49 }
 0x31e   :  { %1753 = vmatpush.bf16.msrb.mxu2 %v2885_v61  ;;  %2048 = vmatpush.bf16.msrb.mxu1 %v3137_v7  ;;  %v3052_v61 = vld [vmem:[#allocation12 + $0x50] sm:$0xf]  ;;  %v3102_v7 = vld [vmem:[#allocation12 + $0xb8] sm:$0xf0] }
 0x31f   :  { %2020 = vmatpush.bf16.msra.mxu3 %v3133_v3  ;;  %v3053_v0 = vor.u32 %v3405_v62, %v3052_v61  ;;  %v3100_v3 = vld [vmem:[#allocation12 + $0xb0] sm:$0xf]  ;;  %v3105_v8 = vor.u32 %v3416_v6, %v3102_v7 }
 0x320   :  { %1781 = vmatpush.bf16.msra.mxu0 %v2889_v63  ;;  %v3404_v63 = vld [vmem:[#allocation12 + $0x54] sm:$0xf]  ;;  %v3101_v5 = vor.u32 %v3417_v4, %v3100_v3 }
 0x321   :  { %v3057_v2 = vor.u32 %v3404_v63, %v3054_v1 }
 0x322   :  { %2006 = vmatpush.bf16.msra.mxu2 %v3069_v16  ;;  %2049 = vmatpush.bf16.msrb.mxu1 %v3129_v15  ;;  %v3092_v15 = vld [vmem:[#allocation12 + $0xa0] sm:$0xf]  ;;  %v3415_v16 = vld [vmem:[#allocation12 + $0xa4] sm:$0xf0] }
 0x323   :  { %2021 = vmatpush.bf16.msra.mxu3 %v3125_v11  ;;  %v3402_v11 = vld [vmem:[#allocation12 + $0x44] sm:$0xf]  ;;  %v3093_v18 = vor.u32 %v3415_v16, %v3092_v15 }
 0x324   :  { %2034 = vmatpush.bf16.msrb.mxu0 %v3073_v17  ;;  %v3049_v14 = vor.u32 %v3402_v11, %v3046_v13  ;;  %v3414_v17 = vld [vmem:[#allocation12 + $0xa4] sm:$0xf] }
 0x326   :  { %2050 = vmatpush.bf16.msrb.mxu1 %v3121_v48  ;;  %2007 = vmatpush.bf16.msra.mxu2 %v3061_v52  ;;  %v3395_v52 = vld [vmem:[#allocation12 + $0x4] sm:$0xf0] }
 0x327   :  { %2022 = vmatpush.bf16.msra.mxu3 %v3117_v46  ;;  %v3397_v46 = vld [vmem:[#allocation12 + $0x14] sm:$0xf0]  ;;  %v3013_v54 = vor.u32 %v3395_v52, %v3012_v51 }
 0x328   :  { %2035 = vmatpush.bf16.msrb.mxu0 %v3065_v56  ;;  %v3021_v48 = vor.u32 %v3397_v46, %v3020_v45  ;;  %v3017_v56 = vor.u32 %v3394_v53, %v3014_v55 }
 0x32a   :  { %2051 = vmatpush.bf16.msrb.mxu1 %v3113_v60  ;;  %2008 = vmatpush.bf16.msra.mxu2 %v3053_v0  ;;  %v1578_v60 = vld [vmem:[%s3874_s14] sm:$0x3] }
 0x32b   :  { %2023 = vmatpush.bf16.msra.mxu3 %v3109_v57  ;;  %v3441_v57 = vld [vmem:[#allocation13 + $0x78] sm:$0xff]  ;;  %v1583_v63 = vperm.slane %v1578_v60, 1  ;;  %v1582_v3 = vperm.slane %v1578_v60, 0 }
 0x32c   :  { %2036 = vmatpush.bf16.msrb.mxu0 %v3057_v2 }
 0x32e   :  { %2052 = vmatpush.bf16.msrb.mxu1 %v3105_v8  ;;  %2009 = vmatpush.bf16.msra.mxu2 %v3045_v12 }
 0x32f   :  { %2024 = vmatpush.bf16.msra.mxu3 %v3101_v5 }
 0x330   :  { %2037 = vmatpush.bf16.msrb.mxu0 %v3049_v14 }
 0x333   :  { %2025 = vmatpush.bf16.msra.mxu3 %v3093_v18 }
 0x390   :  { %v1537_v19 = vpop.f32.mrf.mxu1 }
 0x396   :  { %v1523_v20 = vpop.f32.mrf.mxu0  ;;  %v1509_v23 = vpop.f32.mrf.mxu3 }
 0x397   :  { %v1524_v22 = vadd.f32 %v1523_v20, %v1323_v21 }
 0x398   :  { %v1539_v29 = vpop.f32.mrf.mxu1 }
 0x399   :  { %v1538_v27 = vadd.f32 %v1537_v19, %v1524_v22  ;;  %v3094_v19 = vld [vmem:[#allocation12 + $0xa8] sm:$0xf0]  ;;  %v3401_v22 = vld [vmem:[#allocation12 + $0x34] sm:$0xf0] }
 0x39a   :  { %v3097_v20 = vor.u32 %v3414_v17, %v3094_v19 }
 0x39b   :  { %v1543_v32 = vmax.f32 %v1538_v27, 0.0  ;;  %v3084_v27 = vld [vmem:[#allocation12 + $0x90] sm:$0xf] }
 0x39c   :  { %v1495_v24 = vpop.f32.mrf.mxu2  ;;  %2053 = vmatpush.bf16.msrb.mxu1 %v3097_v20 }
 0x39d   :  { %v1496_v30 = vadd.f32 %v1495_v24, %v1322_v25 }
 0x39e   :  { %v1525_v26 = vpop.f32.mrf.mxu0  ;;  %v1511_v38 = vpop.f32.mrf.mxu3 }
 0x39f   :  { %v1526_v28 = vadd.f32 %v1525_v26, %v1323_v21  ;;  %v1510_v35 = vadd.f32 %v1509_v23, %v1496_v30  ;;  %v3036_v21 = vld [vmem:[#allocation12 + $0x30] sm:$0xf]  ;;  %v3400_v23 = vld [vmem:[#allocation12 + $0x34] sm:$0xf] }
 0x3a0   :  { %v3037_v24 = vor.u32 %v3401_v22, %v3036_v21  ;;  %v3439_v21 = vld [vmem:[#allocation13 + $0x68] sm:$0xff]  ;;  %v3432_v22 = vld [vmem:[#allocation13 + $0x30] sm:$0xff] }
 0x3a1   :  { %v1540_v31 = vadd.f32 %v1539_v29, %v1526_v28  ;;  %v1542_v40 = vmax.f32 %v1510_v35, 0.0  ;;  %v3413_v28 = vld [vmem:[#allocation12 + $0x94] sm:$0xf0]  ;;  %v3412_v29 = vld [vmem:[#allocation12 + $0x94] sm:$0xf] }
 0x3a2   :  { %2010 = vmatpush.bf16.msra.mxu2 %v3037_v24  ;;  %v3085_v30 = vor.u32 %v3413_v28, %v3084_v27  ;;  %v3398_v35 = vld [vmem:[#allocation12 + $0x24] sm:$0xf]  ;;  %v3431_v24 = vld [vmem:[#allocation13 + $0x28] sm:$0xff]  ;;  %v3436_v27 = vld [vmem:[#allocation13 + $0x50] sm:$0xff] }
 0x3a3   :  { %v1545_v33 = vmax.f32 %v1540_v31, 0.0  ;;  %v3086_v31 = vld [vmem:[#allocation12 + $0x98] sm:$0xf0] }
 0x3a4   :  { %v1497_v34 = vpop.f32.mrf.mxu2  ;;  %2026 = vmatpush.bf16.msra.mxu3 %v3085_v30  ;;  %v3429_v28 = vld [vmem:[#allocation13 + $0x18] sm:$0xff]  ;;  %v3428_v30 = vld [vmem:[#allocation13 + $0x10] sm:$0xff] }
 0x3a5   :  { %v1580_v36 = vpack.c.bf16 %v1545_v33, %v1543_v32  ;;  %v1498_v37 = vadd.f32 %v1497_v34, %v1322_v25  ;;  %v3038_v25 = vld [vmem:[#allocation12 + $0x38] sm:$0xf0]  ;;  %v3089_v32 = vor.u32 %v3412_v29, %v3086_v31  ;;  %v3028_v33 = vld [vmem:[#allocation12 + $0x20] sm:$0xf]  ;;  %v3399_v34 = vld [vmem:[#allocation12 + $0x24] sm:$0xf0] }
 0x3a6   :  { %v3041_v26 = vor.u32 %v3400_v23, %v3038_v25  ;;  %v3438_v23 = vld [vmem:[#allocation13 + $0x60] sm:$0xff]  ;;  %v3437_v25 = vld [vmem:[#allocation13 + $0x58] sm:$0xff]  ;;  %v3435_v29 = vld [vmem:[#allocation13 + $0x48] sm:$0xff] }
 0x3a7   :  { %v1512_v39 = vadd.f32 %v1511_v38, %v1498_v37  ;;  %1768 = vmatmul.bf16.vlgmr.msrb.gmra.mxu3 %v1580_v36  ;;  %1796 = vmatmul.bf16.vlgmr.msra.gmra.mxu1 %v1580_v36  ;;  %v3029_v36 = vor.u32 %v3399_v34, %v3028_v33  ;;  %v3030_v37 = vld [vmem:[#allocation12 + $0x28] sm:$0xf0]  ;;  %v3434_v31 = vld [vmem:[#allocation13 + $0x40] sm:$0xff]  ;;  %v1838_v34 = vld [vmem:[%s3876_s16] sm:$0x3] }
 0x3a8   :  { %2038 = vmatpush.bf16.msrb.mxu0 %v3041_v26  ;;  %2054 = vmatpush.bf16.msrb.mxu1 %v3089_v32  ;;  %v3033_v38 = vor.u32 %v3398_v35, %v3030_v37  ;;  %v3430_v26 = vld [vmem:[#allocation13 + $0x20] sm:$0xff]  ;;  %v3427_v32 = vld [vmem:[#allocation13 + $0x8] sm:$0xff]  ;;  %v1843_v37 = vperm.slane %v1838_v34, 1 }
 0x3a9   :  { %v1544_v41 = vmax.f32 %v1512_v39, 0.0  ;;  %v3076_v39 = vld [vmem:[#allocation12 + $0x80] sm:$0xf]  ;;  %2011 = vmatpush.bf16.msra.mxu2 %v3029_v36 }
 0x3aa   :  { %v3426_v33 = vld [vmem:[#allocation13] sm:$0xff] }
 0x3ab   :  { %v1579_v42 = vpack.c.bf16 %v1544_v41, %v1542_v40  ;;  %v3411_v40 = vld [vmem:[#allocation12 + $0x84] sm:$0xf0]  ;;  %v3410_v41 = vld [vmem:[#allocation12 + $0x84] sm:$0xf] }
 0x3ac   :  { %2039 = vmatpush.bf16.msrb.mxu0 %v3033_v38  ;;  %v3081_v44 = vor.u32 %v3410_v41, %v3078_v43  ;;  %v1842_v41 = vperm.slane %v1838_v34, 0 }
 0x3ad   :  { %1754 = vmatmul.bf16.vlgmr.msrb.gmra.mxu2 %v1579_v42  ;;  %1782 = vmatmul.bf16.vlgmr.msra.gmra.mxu0 %v1579_v42  ;;  %v3077_v42 = vor.u32 %v3411_v40, %v3076_v39 }
 0x3ae   :  { %2055 = vmatpush.bf16.msrb.mxu1 %v3081_v44  ;;  %2012 = vmatpush.bf16.msra.mxu2 %v3021_v48 }
 0x3af   :  { %2027 = vmatpush.bf16.msra.mxu3 %v3077_v42 }
 0x3b0   :  { %2040 = vmatpush.bf16.msrb.mxu0 %v3025_v50 }
 0x3b2   :  { %2013 = vmatpush.bf16.msra.mxu2 %v3013_v54 }
 0x3b3   :  { %2214 = vmatpush.bf16.msrb.mxu3 %v3441_v57 }
 0x3b4   :  { %2041 = vmatpush.bf16.msrb.mxu0 %v3017_v56 }
 0x3b6   :  { %2200 = vmatpush.bf16.msrb.mxu2 %v3433_v58 }
 0x3b7   :  { %2215 = vmatpush.bf16.msrb.mxu3 %v3440_v59  ;;  %v3455_v59 = vld [vmem:[%s3878_s18] ss:$0 sm:$0xff] }
 0x3ba   :  { %2201 = vmatpush.bf16.msrb.mxu2 %v3432_v22 }
 0x3bb   :  { %2216 = vmatpush.bf16.msrb.mxu3 %v3439_v21 }
 0x3be   :  { %2202 = vmatpush.bf16.msrb.mxu2 %v3431_v24 }
 0x3bf   :  { %2217 = vmatpush.bf16.msrb.mxu3 %v3438_v23 }
 0x3c2   :  { %2203 = vmatpush.bf16.msrb.mxu2 %v3430_v26 }
 0x3c3   :  { %2218 = vmatpush.bf16.msrb.mxu3 %v3437_v25 }
 0x3c6   :  { %2204 = vmatpush.bf16.msrb.mxu2 %v3429_v28 }
 0x3c7   :  { %2219 = vmatpush.bf16.msrb.mxu3 %v3436_v27 }
 0x3ca   :  { %2205 = vmatpush.bf16.msrb.mxu2 %v3428_v30 }
 0x3cb   :  { %2220 = vmatpush.bf16.msrb.mxu3 %v3435_v29 }
 0x3ce   :  { %2206 = vmatpush.bf16.msrb.mxu2 %v3427_v32 }
 0x3cf   :  { %2221 = vmatpush.bf16.msrb.mxu3 %v3434_v31 }
 0x3d2   :  { %2207 = vmatpush.bf16.msrb.mxu2 %v3426_v33 }
 0x424   :  { %v1797_v61 = vpop.f32.mrf.mxu1 }
 0x42a   :  { %v1783_v62 = vpop.f32.mrf.mxu0  ;;  %v1769_v1 = vpop.f32.mrf.mxu3 }
 0x42b   :  { %v1784_v0 = vadd.f32 %v1783_v62, %v1583_v63 }
 0x42c   :  { %v1799_v7 = vpop.f32.mrf.mxu1 }
 0x42d   :  { %v1798_v5 = vadd.f32 %v1797_v61, %v1784_v0 }
 0x42f   :  { %v1803_v10 = vmax.f32 %v1798_v5, 0.0 }
 0x430   :  { %v1755_v2 = vpop.f32.mrf.mxu2 }
 0x431   :  { %v1756_v8 = vadd.f32 %v1755_v2, %v1582_v3 }
 0x432   :  { %v1785_v4 = vpop.f32.mrf.mxu0  ;;  %v1771_v16 = vpop.f32.mrf.mxu3 }
 0x433   :  { %v1786_v6 = vadd.f32 %v1785_v4, %v1583_v63  ;;  %v1770_v13 = vadd.f32 %v1769_v1, %v1756_v8 }
 0x435   :  { %v1800_v9 = vadd.f32 %v1799_v7, %v1786_v6  ;;  %v1802_v18 = vmax.f32 %v1770_v13, 0.0 }
 0x437   :  { %v1805_v11 = vmax.f32 %v1800_v9, 0.0 }
 0x438   :  { %v1757_v12 = vpop.f32.mrf.mxu2 }
 0x439   :  { %v1840_v14 = vpack.c.bf16 %v1805_v11, %v1803_v10  ;;  %v1758_v15 = vadd.f32 %v1757_v12, %v1582_v3 }
 0x43b   :  { %v1772_v17 = vadd.f32 %v1771_v16, %v1758_v15  ;;  %2028 = vmatmul.bf16.vlgmr.msra.gmra.mxu3 %v1840_v14  ;;  %2056 = vmatmul.bf16.vlgmr.msrb.gmra.mxu1 %v1840_v14 }
 0x43d   :  { %v1804_v19 = vmax.f32 %v1772_v17, 0.0 }
 0x43f   :  { %v1839_v20 = vpack.c.bf16 %v1804_v19, %v1802_v18 }
 0x441   :  { %2014 = vmatmul.bf16.vlgmr.msra.gmra.mxu2 %v1839_v20  ;;  %2042 = vmatmul.bf16.vlgmr.msrb.gmra.mxu0 %v1839_v20 }
 0x4b8   :  { %v2057_v35 = vpop.f32.mrf.mxu1 }
 0x4be   :  { %v2043_v36 = vpop.f32.mrf.mxu0  ;;  %v2029_v39 = vpop.f32.mrf.mxu3 }
 0x4bf   :  { %v2044_v38 = vadd.f32 %v2043_v36, %v1843_v37 }
 0x4c0   :  { %v2059_v45 = vpop.f32.mrf.mxu1 }
 0x4c1   :  { %v2058_v43 = vadd.f32 %v2057_v35, %v2044_v38 }
 0x4c3   :  { %v2063_v48 = vmax.f32 %v2058_v43, 0.0 }
 0x4c4   :  { %v2015_v40 = vpop.f32.mrf.mxu2 }
 0x4c5   :  { %v2016_v46 = vadd.f32 %v2015_v40, %v1842_v41 }
 0x4c6   :  { %v2045_v42 = vpop.f32.mrf.mxu0  ;;  %v2031_v54 = vpop.f32.mrf.mxu3 }
 0x4c7   :  { %v2046_v44 = vadd.f32 %v2045_v42, %v1843_v37  ;;  %v2030_v51 = vadd.f32 %v2029_v39, %v2016_v46 }
 0x4c9   :  { %v2060_v47 = vadd.f32 %v2059_v45, %v2046_v44  ;;  %v2062_v56 = vmax.f32 %v2030_v51, 0.0 }
 0x4cb   :  { %v2065_v49 = vmax.f32 %v2060_v47, 0.0 }
 0x4cc   :  { %v2017_v50 = vpop.f32.mrf.mxu2 }
 0x4cd   :  { %v2100_v52 = vpack.c.bf16 %v2065_v49, %v2063_v48  ;;  %v2018_v53 = vadd.f32 %v2017_v50, %v1842_v41 }
 0x4cf   :  { %v2032_v55 = vadd.f32 %v2031_v54, %v2018_v53  ;;  %2222 = vmatmul.bf16.vlgmr.msrb.gmra.mxu3 %v2100_v52 }
 0x4d1   :  { %v2064_v57 = vmax.f32 %v2032_v55, 0.0 }
 0x4d3   :  { %v2099_v58 = vpack.c.bf16 %v2064_v57, %v2062_v56 }
 0x4d5   :  { %2208 = vmatmul.bf16.vlgmr.msrb.gmra.mxu2 %v2099_v58 }
 0x552   :  { %v2223_v60 = vpop.f32.mrf.mxu3 }
 0x558   :  { %v2209_v61 = vpop.f32.mrf.mxu2 }
 0x559   :  { %v2210_v62 = vadd.f32 %v3455_v59, %v2209_v61 }
 0x55a   :  { %v2225_v2 = vpop.f32.mrf.mxu3 }
 0x55b   :  { %v2224_v63 = vadd.f32 %v2223_v60, %v2210_v62 }
 0x55d   :  { %2229 = vst.msk [vmem:[%s3879_s19] sm:$0xff] %vm2228_vm3, %v2224_v63 }
 0x560   :  { %v2211_v0 = vpop.f32.mrf.mxu2 }
 0x561   :  { %v2212_v1 = vadd.f32 %v3455_v59, %v2211_v0 }
 0x563   :  { %v2226_v3 = vadd.f32 %v2225_v2, %v2212_v1 }
 0x565   :  { %2230 = vst.msk [vmem:[%s3879_s19 + $0x8] sm:$0xff] %vm2228_vm3, %v2226_v3 }
 0x566   :  { %2235 = vsyncpa [#allocation3], 1 }
 0x567   :  { %2236 = vsyncpa [#allocation5], 1 }
 0x568   :  { %2237 = vsyncpa [#allocation8], 1 }
 0x569   :  { %2238 = vsyncpa [#allocation11], 1 }
 0x56a   :  { %2239 = vsyncpa [#allocation14], 1 }

</bundles_post_ra>
